<compile_context>
chip_gen: v5e
topology: v5e:2x2
jax: 0.10.0
libtpu: 0.0.40
codegen_flags: <defaults>
</compile_context>

<pallas_src>
import functools

import jax
import jax.numpy as jnp
from jax.experimental import pallas as pl
from jax.experimental.pallas import tpu as pltpu

_LANE = 128


def _grad_loss_kernel(*refs, scales, tile_rows, width, halo_rows, multi_tile):
    """One (image, H-tile) step: per-scale numerator/denominator partial sums."""
    if multi_tile:
        p_ref, t_ref, m_ref, ph_ref, th_ref, mh_ref, num_ref, den_ref = refs
    else:
        p_ref, t_ref, m_ref, num_ref, den_ref = refs

    h = pl.program_id(1)

    p = p_ref[0].astype(jnp.float32)            # (T, W)
    t = t_ref[0].astype(jnp.float32)
    m = m_ref[0].astype(jnp.float32)
    d = m * (p - t)                             # masked disparity difference

    if multi_tile:
        ph = ph_ref[0].astype(jnp.float32)      # (halo_rows, W): rows just above
        th_ = th_ref[0].astype(jnp.float32)
        mh = mh_ref[0].astype(jnp.float32)
        dh = mh * (ph - th_)

    row_ids = jax.lax.broadcasted_iota(jnp.int32, (tile_rows, 1), 0)
    col_ids = jax.lax.broadcasted_iota(jnp.int32, (1, width), 1)
    lane_ids = jax.lax.broadcasted_iota(jnp.int32, (1, scales), 1)

    num_vec = jnp.zeros((1, scales), jnp.float32)
    den_vec = jnp.zeros((1, scales), jnp.float32)

    # TODO(synk): row-subsample coarse scales (process every step-th row only)
    #             to cut VPU work ~2x on v6e.
    # TODO(synk): offload the per-scale tile reductions to the MXU (ones-column
    #             matmul) on v7x, where the kernel is VPU-bound and MXU idles.
    for s in range(scales):
        step = 1 << s
        # ::step sub-grid keep masks (local row index == global index mod step
        # because tile_rows is a multiple of every step).
        if step == 1:
            row_keep = None
            col_keep = None
            m_rk = m                              # m * row_keep
            m_ck = m                              # m * col_keep
        else:
            row_keep = jnp.where((row_ids & (step - 1)) == 0, 1.0, 0.0)
            col_keep = jnp.where((col_ids & (step - 1)) == 0, 1.0, 0.0)
            m_rk = m * row_keep
            m_ck = m * col_keep

        # Edge-validity masks kill the cyclic wrap-around of the rolls; by
        # keep-mask periodicity only the unshifted keep factor is needed.
        x_valid = jnp.where(col_ids < width - step, 1.0, 0.0)
        y_valid = jnp.where(row_ids < tile_rows - step, 1.0, 0.0)
        col_keep_x = x_valid if col_keep is None else col_keep * x_valid
        row_keep_y = y_valid if row_keep is None else row_keep * y_valid

        # Denominator: mask restricted to the ::step sub-grid.
        if step == 1:
            den_s = jnp.sum(m, keepdims=True)                      # (1, 1)
        else:
            den_s = jnp.sum(m_rk * col_keep, keepdims=True)

        # x-gradient: pair (r, c) with (r, c + step) via a lane rotate (XLU).
        d_x = pltpu.roll(d, shift=width - step, axis=1)            # d[., c+step]
        m_x = pltpu.roll(m, shift=width - step, axis=1)
        gx = jnp.abs(d_x - d) * (m_x * m_rk) * col_keep_x
        num_s = jnp.sum(gx, keepdims=True)

        # y-gradient: pair (r, c) with (r + step, c) via a sublane rotate (XLU).
        d_y = pltpu.roll(d, shift=tile_rows - step, axis=0)        # d[r+step, .]
        m_y = pltpu.roll(m, shift=tile_rows - step, axis=0)
        gy = jnp.abs(d_y - d) * (m_y * m_ck) * row_keep_y
        num_s = num_s + jnp.sum(gy, keepdims=True)

        # y-gradient across the H-tile boundary: previous tile's row
        # (global h*T - step, read from the halo) pairs with local row 0.
        if multi_tile:
            lo = halo_rows - step
            bnd = (jnp.abs(d[0:1, :] - dh[lo:lo + 1, :])
                   * (mh[lo:lo + 1, :] * m[0:1, :]))
            if col_keep is not None:
                bnd = bnd * col_keep
            bnd_sum = jnp.sum(bnd, keepdims=True)
            # First H tile of an image has no predecessor.
            num_s = num_s + jnp.where(h > 0, bnd_sum, jnp.zeros_like(bnd_sum))

        sel = jnp.where(lane_ids == s, 1.0, 0.0)                   # one-hot
        num_vec = num_vec + num_s * sel
        den_vec = den_vec + den_s * sel

    num_ref[...] = num_vec.reshape(1, 1, scales)
    den_ref[...] = den_vec.reshape(1, 1, scales)


def _vmem_capacity_bytes():
    try:
        return int(pltpu.get_tpu_info().vmem_capacity_bytes)
    except Exception:
        return 64 * 1024 * 1024          # conservative (v7x-sized) default


def _round_up(x, m):
    return ((x + m - 1) // m) * m


def _tile_plan(height, width, itemsizes, max_step, tile_rows):
    """H-tile rows, padded H/W, halo rows and VMEM capacity (generation-aware)."""
    min_item = min(itemsizes)
    sublane = max(8, 32 // min_item)        # f32 -> 8, bf16 -> 16, int8 -> 32
    row_multiple = max(max_step, sublane)   # both powers of two
    w_pad = _round_up(width, _LANE)         # lane-dense blocks, native rotates

    vmem_cap = _vmem_capacity_bytes()
    tile_budget = max(8 << 20, vmem_cap // 3)   # ~42 MiB v5e/v6e, ~21 MiB v7x

    if tile_rows is not None:
        if tile_rows <= 0 or tile_rows % row_multiple != 0:
            raise ValueError(
                f"tile_rows={tile_rows} must be a positive multiple of {row_multiple}")
        th = tile_rows
    else:
        # double-buffered input blocks + f32 in-kernel working-set headroom
        bytes_per_row = w_pad * (2 * sum(itemsizes) + 8 * 4)
        rows = max(row_multiple, tile_budget // max(bytes_per_row, 1))
        rows = (rows // row_multiple) * row_multiple
        th = min(rows, _round_up(height, row_multiple))

    h_pad = _round_up(height, th)
    return th, h_pad, w_pad, row_multiple, vmem_cap


@functools.partial(jax.jit,
                   static_argnames=("scales", "reduction_type", "tile_rows"))
def gradient_loss(prediction, target, mask, scales=4, reduction_type="batch",
                  tile_rows=None):
    """Forward pass of GradientLoss (multiscale masked gradient matching loss)."""
    if prediction.ndim != 3:
        raise ValueError("expected [B, H, W] inputs")
    if mask.dtype == jnp.bool_:
        mask = mask.astype(jnp.int8)     # narrow HBM reads; kernel upcasts to f32

    batch, height, width = prediction.shape
    max_step = 1 << (scales - 1)
    itemsizes = (prediction.dtype.itemsize, target.dtype.itemsize,
                 mask.dtype.itemsize)
    th, h_pad, w_pad, halo_rows, vmem_cap = _tile_plan(
        height, width, itemsizes, max_step, tile_rows)
    n_h = h_pad // th
    multi_tile = n_h > 1

    # Zero-pad to lane-dense W and tile-aligned H.  Padded mask == 0 zeroes all
    # gradient and denominator contributions, so this is numerically exact.
    if h_pad != height or w_pad != width:
        pad = ((0, 0), (0, h_pad - height), (0, w_pad - width))
        prediction = jnp.pad(prediction, pad)
        target = jnp.pad(target, pad)
        mask = jnp.pad(mask, pad)

    kernel = functools.partial(
        _grad_loss_kernel, scales=scales, tile_rows=th, width=w_pad,
        halo_rows=halo_rows, multi_tile=multi_tile)

    block_in = pl.BlockSpec((1, th, w_pad), lambda b, h: (b, h, 0))
    block_out = pl.BlockSpec((1, 1, scales), lambda b, h: (b * n_h + h, 0, 0))

    in_specs = [block_in, block_in, block_in]
    operands = [prediction, target, mask]
    if multi_tile:
        ratio = th // halo_rows
        halo_spec = pl.BlockSpec(
            (1, halo_rows, w_pad),
            lambda b, h: (b, jnp.maximum(h * ratio - 1, 0), 0))
        in_specs += [halo_spec, halo_spec, halo_spec]
        operands += [prediction, target, mask]

    num, den = pl.pallas_call(
        kernel,
        out_shape=(jax.ShapeDtypeStruct((batch * n_h, 1, scales), jnp.float32),
                   jax.ShapeDtypeStruct((batch * n_h, 1, scales), jnp.float32)),
        grid_spec=pltpu.PrefetchScalarGridSpec(
            num_scalar_prefetch=0,
            grid=(batch, n_h),
            in_specs=in_specs,
            out_specs=(block_out, block_out)),
        compiler_params=pltpu.CompilerParams(
            dimension_semantics=("parallel", "parallel"),
            vmem_limit_bytes=int(vmem_cap * 9 // 10)),
    )(*operands)

    image_loss = jnp.sum(num.reshape(batch, n_h, scales), axis=1)   # (B, scales)
    summed_mask = jnp.sum(den.reshape(batch, n_h, scales), axis=1)  # (B, scales)

    # masked_reduction (nerfstudio semantics), applied per scale then summed.
    if reduction_type == "batch":
        divisor = jnp.sum(summed_mask, axis=0)                      # (scales,)
        safe = jnp.where(divisor == 0, 1.0, divisor)
        per_scale = jnp.where(divisor == 0, 0.0,
                              jnp.sum(image_loss, axis=0) / safe)
        return jnp.sum(per_scale)
    elif reduction_type == "image":
        valid = summed_mask > 0
        safe = jnp.where(valid, summed_mask, 1.0)
        normalized = jnp.where(valid, image_loss / safe, image_loss)
        return jnp.sum(jnp.mean(normalized, axis=0))
    else:
        raise ValueError(f"unknown reduction_type {reduction_type!r}")


def _gradient_loss_ref(prediction, target, mask, scales=4,
                       reduction_type="batch"):
    """Pure-JAX reference mirroring the PyTorch module (for validation)."""
    prediction = prediction.astype(jnp.float32)
    target = target.astype(jnp.float32)
    mask = mask.astype(jnp.float32)
    total = jnp.float32(0.0)
    for scale in range(scales):
        step = 2 ** scale
        p = prediction[:, ::step, ::step]
        t = target[:, ::step, ::step]
        m = mask[:, ::step, ::step]
        diff = m * (p - t)
        gx = jnp.abs(diff[:, :, 1:] - diff[:, :, :-1]) * (m[:, :, 1:] * m[:, :, :-1])
        gy = jnp.abs(diff[:, 1:, :] - diff[:, :-1, :]) * (m[:, 1:, :] * m[:, :-1, :])
        image_loss = jnp.sum(gx, axis=(1, 2)) + jnp.sum(gy, axis=(1, 2))
        summed_mask = jnp.sum(m, axis=(1, 2))
        if reduction_type == "batch":
            divisor = jnp.sum(summed_mask)
            safe = jnp.where(divisor == 0, 1.0, divisor)
            total = total + jnp.where(divisor == 0, 0.0,
                                      jnp.sum(image_loss) / safe)
        else:
            valid = summed_mask > 0
            safe = jnp.where(valid, summed_mask, 1.0)
            normalized = jnp.where(valid, image_loss / safe, image_loss)
            total = total + jnp.mean(normalized)
    return total


if __name__ == "__main__":
    key = jax.random.PRNGKey(0)
    k1, k2, k3 = jax.random.split(key, 3)

    B, H, W = 2, 64, 36
    prediction = jax.random.normal(k1, (B, H, W), dtype=jnp.float32)
    target = jax.random.normal(k2, (B, H, W), dtype=jnp.float32)
    mask = (jax.random.uniform(k3, (B, H, W)) > 0.3).astype(jnp.float32)

    for reduction_type in ("batch", "image"):
        ref = jax.block_until_ready(
            _gradient_loss_ref(prediction, target, mask, 4, reduction_type))
        # Auto-sized path (single H tile at this size).
        auto = jax.block_until_ready(
            gradient_loss(prediction, target, mask, scales=4,
                          reduction_type=reduction_type))
        # Multi-tile path: 2 H-tiles of 32 rows -> exercises the halo boundary
        # term, per-tile partial sums, and the fully parallel grid.
        tiled = jax.block_until_ready(
            gradient_loss(prediction, target, mask, scales=4,
                          reduction_type=reduction_type, tile_rows=32))
        assert jnp.allclose(auto, ref, rtol=1e-5, atol=1e-5), (
            reduction_type, auto, ref)
        assert jnp.allclose(tiled, ref, rtol=1e-5, atol=1e-5), (
            reduction_type, tiled, ref)

    # Narrow-dtype path (bf16 prediction/target; kernel upcasts per VMEM tile).
    p_bf = prediction.astype(jnp.bfloat16)
    t_bf = target.astype(jnp.bfloat16)
    ref_bf = jax.block_until_ready(
        _gradient_loss_ref(p_bf, t_bf, mask, 4, "batch"))
    out_bf = jax.block_until_ready(
        gradient_loss(p_bf, t_bf, mask, scales=4, reduction_type="batch",
                      tile_rows=32))
    assert jnp.allclose(out_bf, ref_bf, rtol=1e-4, atol=1e-4), (out_bf, ref_bf)

    print("KERNEL_OK")
</pallas_src>

<mosaic_0001>
module attributes {stable_mosaic.version = 11 : i64} {
  func.func @_grad_loss_kernel(%arg0: i32, %arg1: i32, %arg2: memref<1x64x128xf32, #tpu.memory_space<vmem>>, %arg3: memref<1x64x128xf32, #tpu.memory_space<vmem>>, %arg4: memref<1x64x128xf32, #tpu.memory_space<vmem>>, %arg5: memref<1x1x4xf32, #tpu.memory_space<vmem>>, %arg6: memref<1x1x4xf32, #tpu.memory_space<vmem>>) attributes {dimension_semantics = [#tpu.dimension_semantics<parallel>, #tpu.dimension_semantics<parallel>], iteration_bounds = array<i64: 2, 1>, scalar_prefetch = 0 : i64, scratch_operands = 0 : i64, tpu.core_type = #tpu.core_type<tc>, window_params = [{transform_indices = @transform_0, window_bounds = array<i64: 1, 64, 128>}, {transform_indices = @transform_1, window_bounds = array<i64: 1, 64, 128>}, {transform_indices = @transform_2, window_bounds = array<i64: 1, 64, 128>}, {transform_indices = @transform_3, window_bounds = array<i64: 1, 1, 4>}, {transform_indices = @transform_4, window_bounds = array<i64: 1, 1, 4>}]} {
    %c0 = arith.constant 0 : index
    %c0_0 = arith.constant 0 : index
    %c0_1 = arith.constant 0 : index
    %0 = vector.load %arg2[%c0, %c0_0, %c0_1] : memref<1x64x128xf32, #tpu.memory_space<vmem>>, vector<1x64x128xf32>
    %1 = vector.shape_cast %0 : vector<1x64x128xf32> to vector<64x128xf32>
    %c0_2 = arith.constant 0 : index
    %c0_3 = arith.constant 0 : index
    %c0_4 = arith.constant 0 : index
    %2 = vector.load %arg3[%c0_2, %c0_3, %c0_4] : memref<1x64x128xf32, #tpu.memory_space<vmem>>, vector<1x64x128xf32>
    %3 = vector.shape_cast %2 : vector<1x64x128xf32> to vector<64x128xf32>
    %c0_5 = arith.constant 0 : index
    %c0_6 = arith.constant 0 : index
    %c0_7 = arith.constant 0 : index
    %4 = vector.load %arg4[%c0_5, %c0_6, %c0_7] : memref<1x64x128xf32, #tpu.memory_space<vmem>>, vector<1x64x128xf32>
    %5 = vector.shape_cast %4 : vector<1x64x128xf32> to vector<64x128xf32>
    %6 = arith.subf %1, %3 : vector<64x128xf32>
    %7 = arith.mulf %5, %6 : vector<64x128xf32>
    %8 = tpu.iota {dimensions = array<i32: 0>} : vector<64x1xi32>
    %9 = tpu.iota {dimensions = array<i32: 1>} : vector<1x128xi32>
    %10 = tpu.iota {dimensions = array<i32: 1>} : vector<1x4xi32>
    %cst = arith.constant 0.000000e+00 : f32
    %11 = vector.broadcast %cst : f32 to vector<1x4xf32>
    %cst_8 = arith.constant 0.000000e+00 : f32
    %12 = vector.broadcast %cst_8 : f32 to vector<1x4xf32>
    %c127_i32 = arith.constant 127 : i32
    %13 = vector.broadcast %c127_i32 : i32 to vector<1x128xi32>
    %14 = arith.cmpi slt, %9, %13 : vector<1x128xi32>
    %cst_9 = arith.constant 1.000000e+00 : f32
    %cst_10 = arith.constant 0.000000e+00 : f32
    %15 = vector.broadcast %cst_9 : f32 to vector<1x128xf32>
    %16 = vector.broadcast %cst_10 : f32 to vector<1x128xf32>
    %17 = arith.select %14, %15, %16 : vector<1x128xi1>, vector<1x128xf32>
    %c63_i32 = arith.constant 63 : i32
    %18 = vector.broadcast %c63_i32 : i32 to vector<64x1xi32>
    %19 = arith.cmpi slt, %8, %18 : vector<64x1xi32>
    %cst_11 = arith.constant 1.000000e+00 : f32
    %cst_12 = arith.constant 0.000000e+00 : f32
    %20 = vector.broadcast %cst_11 : f32 to vector<64x1xf32>
    %21 = vector.broadcast %cst_12 : f32 to vector<64x1xf32>
    %22 = arith.select %19, %20, %21 : vector<64x1xi1>, vector<64x1xf32>
    %23 = vector.shape_cast %5 : vector<64x128xf32> to vector<1x64x128xf32>
    %cst_13 = arith.constant dense<0.000000e+00> : vector<1xf32>
    %24 = vector.multi_reduction <add>, %23, %cst_13 [1, 2] : vector<1x64x128xf32> to vector<1xf32>
    %25 = vector.shape_cast %24 : vector<1xf32> to vector<1x1x1xf32>
    %26 = vector.extract %25[0, 0, 0] : f32 from vector<1x1x1xf32>
    %27 = vector.broadcast %26 : f32 to vector<1x1xf32>
    %c127_i32_14 = arith.constant 127 : i32
    %28 = tpu.dynamic_rotate %7 by %c127_i32_14 dim 1 : vector<64x128xf32>, i32 -> vector<64x128xf32>
    %c127_i32_15 = arith.constant 127 : i32
    %29 = tpu.dynamic_rotate %5 by %c127_i32_15 dim 1 : vector<64x128xf32>, i32 -> vector<64x128xf32>
    %30 = arith.subf %28, %7 : vector<64x128xf32>
    %31 = math.absf %30 : vector<64x128xf32>
    %32 = arith.mulf %29, %5 : vector<64x128xf32>
    %33 = arith.mulf %31, %32 : vector<64x128xf32>
    %34 = vector.broadcast %17 : vector<1x128xf32> to vector<64x128xf32>
    %35 = arith.mulf %33, %34 : vector<64x128xf32>
    %36 = vector.shape_cast %35 : vector<64x128xf32> to vector<1x64x128xf32>
    %cst_16 = arith.constant dense<0.000000e+00> : vector<1xf32>
    %37 = vector.multi_reduction <add>, %36, %cst_16 [1, 2] : vector<1x64x128xf32> to vector<1xf32>
    %38 = vector.shape_cast %37 : vector<1xf32> to vector<1x1x1xf32>
    %39 = vector.extract %38[0, 0, 0] : f32 from vector<1x1x1xf32>
    %40 = vector.broadcast %39 : f32 to vector<1x1xf32>
    %c63_i32_17 = arith.constant 63 : i32
    %41 = tpu.dynamic_rotate %7 by %c63_i32_17 dim 0 : vector<64x128xf32>, i32 -> vector<64x128xf32>
    %c63_i32_18 = arith.constant 63 : i32
    %42 = tpu.dynamic_rotate %5 by %c63_i32_18 dim 0 : vector<64x128xf32>, i32 -> vector<64x128xf32>
    %43 = arith.subf %41, %7 : vector<64x128xf32>
    %44 = math.absf %43 : vector<64x128xf32>
    %45 = arith.mulf %42, %5 : vector<64x128xf32>
    %46 = arith.mulf %44, %45 : vector<64x128xf32>
    %47 = vector.broadcast %22 : vector<64x1xf32> to vector<64x128xf32>
    %48 = arith.mulf %46, %47 : vector<64x128xf32>
    %49 = vector.shape_cast %48 : vector<64x128xf32> to vector<1x64x128xf32>
    %cst_19 = arith.constant dense<0.000000e+00> : vector<1xf32>
    %50 = vector.multi_reduction <add>, %49, %cst_19 [1, 2] : vector<1x64x128xf32> to vector<1xf32>
    %51 = vector.shape_cast %50 : vector<1xf32> to vector<1x1x1xf32>
    %52 = vector.extract %51[0, 0, 0] : f32 from vector<1x1x1xf32>
    %53 = vector.broadcast %52 : f32 to vector<1x1xf32>
    %54 = arith.addf %40, %53 : vector<1x1xf32>
    %c0_i32 = arith.constant 0 : i32
    %55 = vector.broadcast %c0_i32 : i32 to vector<1x4xi32>
    %56 = arith.cmpi eq, %10, %55 : vector<1x4xi32>
    %cst_20 = arith.constant 1.000000e+00 : f32
    %cst_21 = arith.constant 0.000000e+00 : f32
    %57 = vector.broadcast %cst_20 : f32 to vector<1x4xf32>
    %58 = vector.broadcast %cst_21 : f32 to vector<1x4xf32>
    %59 = arith.select %56, %57, %58 : vector<1x4xi1>, vector<1x4xf32>
    %60 = vector.broadcast %54 : vector<1x1xf32> to vector<1x4xf32>
    %61 = arith.mulf %60, %59 : vector<1x4xf32>
    %62 = arith.addf %11, %61 : vector<1x4xf32>
    %63 = vector.broadcast %27 : vector<1x1xf32> to vector<1x4xf32>
    %64 = arith.mulf %63, %59 : vector<1x4xf32>
    %65 = arith.addf %12, %64 : vector<1x4xf32>
    %c1_i32 = arith.constant 1 : i32
    %66 = vector.broadcast %c1_i32 : i32 to vector<64x1xi32>
    %67 = arith.andi %8, %66 : vector<64x1xi32>
    %c0_i32_22 = arith.constant 0 : i32
    %68 = vector.broadcast %c0_i32_22 : i32 to vector<64x1xi32>
    %69 = arith.cmpi eq, %67, %68 : vector<64x1xi32>
    %cst_23 = arith.constant 1.000000e+00 : f32
    %cst_24 = arith.constant 0.000000e+00 : f32
    %70 = vector.broadcast %cst_23 : f32 to vector<64x1xf32>
    %71 = vector.broadcast %cst_24 : f32 to vector<64x1xf32>
    %72 = arith.select %69, %70, %71 : vector<64x1xi1>, vector<64x1xf32>
    %c1_i32_25 = arith.constant 1 : i32
    %73 = vector.broadcast %c1_i32_25 : i32 to vector<1x128xi32>
    %74 = arith.andi %9, %73 : vector<1x128xi32>
    %c0_i32_26 = arith.constant 0 : i32
    %75 = vector.broadcast %c0_i32_26 : i32 to vector<1x128xi32>
    %76 = arith.cmpi eq, %74, %75 : vector<1x128xi32>
    %cst_27 = arith.constant 1.000000e+00 : f32
    %cst_28 = arith.constant 0.000000e+00 : f32
    %77 = vector.broadcast %cst_27 : f32 to vector<1x128xf32>
    %78 = vector.broadcast %cst_28 : f32 to vector<1x128xf32>
    %79 = arith.select %76, %77, %78 : vector<1x128xi1>, vector<1x128xf32>
    %80 = vector.broadcast %72 : vector<64x1xf32> to vector<64x128xf32>
    %81 = arith.mulf %5, %80 : vector<64x128xf32>
    %82 = vector.broadcast %79 : vector<1x128xf32> to vector<64x128xf32>
    %83 = arith.mulf %5, %82 : vector<64x128xf32>
    %c126_i32 = arith.constant 126 : i32
    %84 = vector.broadcast %c126_i32 : i32 to vector<1x128xi32>
    %85 = arith.cmpi slt, %9, %84 : vector<1x128xi32>
    %cst_29 = arith.constant 1.000000e+00 : f32
    %cst_30 = arith.constant 0.000000e+00 : f32
    %86 = vector.broadcast %cst_29 : f32 to vector<1x128xf32>
    %87 = vector.broadcast %cst_30 : f32 to vector<1x128xf32>
    %88 = arith.select %85, %86, %87 : vector<1x128xi1>, vector<1x128xf32>
    %c62_i32 = arith.constant 62 : i32
    %89 = vector.broadcast %c62_i32 : i32 to vector<64x1xi32>
    %90 = arith.cmpi slt, %8, %89 : vector<64x1xi32>
    %cst_31 = arith.constant 1.000000e+00 : f32
    %cst_32 = arith.constant 0.000000e+00 : f32
    %91 = vector.broadcast %cst_31 : f32 to vector<64x1xf32>
    %92 = vector.broadcast %cst_32 : f32 to vector<64x1xf32>
    %93 = arith.select %90, %91, %92 : vector<64x1xi1>, vector<64x1xf32>
    %94 = arith.mulf %79, %88 : vector<1x128xf32>
    %95 = arith.mulf %72, %93 : vector<64x1xf32>
    %96 = vector.broadcast %79 : vector<1x128xf32> to vector<64x128xf32>
    %97 = arith.mulf %81, %96 : vector<64x128xf32>
    %98 = vector.shape_cast %97 : vector<64x128xf32> to vector<1x64x128xf32>
    %cst_33 = arith.constant dense<0.000000e+00> : vector<1xf32>
    %99 = vector.multi_reduction <add>, %98, %cst_33 [1, 2] : vector<1x64x128xf32> to vector<1xf32>
    %100 = vector.shape_cast %99 : vector<1xf32> to vector<1x1x1xf32>
    %101 = vector.extract %100[0, 0, 0] : f32 from vector<1x1x1xf32>
    %102 = vector.broadcast %101 : f32 to vector<1x1xf32>
    %c126_i32_34 = arith.constant 126 : i32
    %103 = tpu.dynamic_rotate %7 by %c126_i32_34 dim 1 : vector<64x128xf32>, i32 -> vector<64x128xf32>
    %c126_i32_35 = arith.constant 126 : i32
    %104 = tpu.dynamic_rotate %5 by %c126_i32_35 dim 1 : vector<64x128xf32>, i32 -> vector<64x128xf32>
    %105 = arith.subf %103, %7 : vector<64x128xf32>
    %106 = math.absf %105 : vector<64x128xf32>
    %107 = arith.mulf %104, %81 : vector<64x128xf32>
    %108 = arith.mulf %106, %107 : vector<64x128xf32>
    %109 = vector.broadcast %94 : vector<1x128xf32> to vector<64x128xf32>
    %110 = arith.mulf %108, %109 : vector<64x128xf32>
    %111 = vector.shape_cast %110 : vector<64x128xf32> to vector<1x64x128xf32>
    %cst_36 = arith.constant dense<0.000000e+00> : vector<1xf32>
    %112 = vector.multi_reduction <add>, %111, %cst_36 [1, 2] : vector<1x64x128xf32> to vector<1xf32>
    %113 = vector.shape_cast %112 : vector<1xf32> to vector<1x1x1xf32>
    %114 = vector.extract %113[0, 0, 0] : f32 from vector<1x1x1xf32>
    %115 = vector.broadcast %114 : f32 to vector<1x1xf32>
    %c62_i32_37 = arith.constant 62 : i32
    %116 = tpu.dynamic_rotate %7 by %c62_i32_37 dim 0 : vector<64x128xf32>, i32 -> vector<64x128xf32>
    %c62_i32_38 = arith.constant 62 : i32
    %117 = tpu.dynamic_rotate %5 by %c62_i32_38 dim 0 : vector<64x128xf32>, i32 -> vector<64x128xf32>
    %118 = arith.subf %116, %7 : vector<64x128xf32>
    %119 = math.absf %118 : vector<64x128xf32>
    %120 = arith.mulf %117, %83 : vector<64x128xf32>
    %121 = arith.mulf %119, %120 : vector<64x128xf32>
    %122 = vector.broadcast %95 : vector<64x1xf32> to vector<64x128xf32>
    %123 = arith.mulf %121, %122 : vector<64x128xf32>
    %124 = vector.shape_cast %123 : vector<64x128xf32> to vector<1x64x128xf32>
    %cst_39 = arith.constant dense<0.000000e+00> : vector<1xf32>
    %125 = vector.multi_reduction <add>, %124, %cst_39 [1, 2] : vector<1x64x128xf32> to vector<1xf32>
    %126 = vector.shape_cast %125 : vector<1xf32> to vector<1x1x1xf32>
    %127 = vector.extract %126[0, 0, 0] : f32 from vector<1x1x1xf32>
    %128 = vector.broadcast %127 : f32 to vector<1x1xf32>
    %129 = arith.addf %115, %128 : vector<1x1xf32>
    %c1_i32_40 = arith.constant 1 : i32
    %130 = vector.broadcast %c1_i32_40 : i32 to vector<1x4xi32>
    %131 = arith.cmpi eq, %10, %130 : vector<1x4xi32>
    %cst_41 = arith.constant 1.000000e+00 : f32
    %cst_42 = arith.constant 0.000000e+00 : f32
    %132 = vector.broadcast %cst_41 : f32 to vector<1x4xf32>
    %133 = vector.broadcast %cst_42 : f32 to vector<1x4xf32>
    %134 = arith.select %131, %132, %133 : vector<1x4xi1>, vector<1x4xf32>
    %135 = vector.broadcast %129 : vector<1x1xf32> to vector<1x4xf32>
    %136 = arith.mulf %135, %134 : vector<1x4xf32>
    %137 = arith.addf %62, %136 : vector<1x4xf32>
    %138 = vector.broadcast %102 : vector<1x1xf32> to vector<1x4xf32>
    %139 = arith.mulf %138, %134 : vector<1x4xf32>
    %140 = arith.addf %65, %139 : vector<1x4xf32>
    %c3_i32 = arith.constant 3 : i32
    %141 = vector.broadcast %c3_i32 : i32 to vector<64x1xi32>
    %142 = arith.andi %8, %141 : vector<64x1xi32>
    %c0_i32_43 = arith.constant 0 : i32
    %143 = vector.broadcast %c0_i32_43 : i32 to vector<64x1xi32>
    %144 = arith.cmpi eq, %142, %143 : vector<64x1xi32>
    %cst_44 = arith.constant 1.000000e+00 : f32
    %cst_45 = arith.constant 0.000000e+00 : f32
    %145 = vector.broadcast %cst_44 : f32 to vector<64x1xf32>
    %146 = vector.broadcast %cst_45 : f32 to vector<64x1xf32>
    %147 = arith.select %144, %145, %146 : vector<64x1xi1>, vector<64x1xf32>
    %c3_i32_46 = arith.constant 3 : i32
    %148 = vector.broadcast %c3_i32_46 : i32 to vector<1x128xi32>
    %149 = arith.andi %9, %148 : vector<1x128xi32>
    %c0_i32_47 = arith.constant 0 : i32
    %150 = vector.broadcast %c0_i32_47 : i32 to vector<1x128xi32>
    %151 = arith.cmpi eq, %149, %150 : vector<1x128xi32>
    %cst_48 = arith.constant 1.000000e+00 : f32
    %cst_49 = arith.constant 0.000000e+00 : f32
    %152 = vector.broadcast %cst_48 : f32 to vector<1x128xf32>
    %153 = vector.broadcast %cst_49 : f32 to vector<1x128xf32>
    %154 = arith.select %151, %152, %153 : vector<1x128xi1>, vector<1x128xf32>
    %155 = vector.broadcast %147 : vector<64x1xf32> to vector<64x128xf32>
    %156 = arith.mulf %5, %155 : vector<64x128xf32>
    %157 = vector.broadcast %154 : vector<1x128xf32> to vector<64x128xf32>
    %158 = arith.mulf %5, %157 : vector<64x128xf32>
    %c124_i32 = arith.constant 124 : i32
    %159 = vector.broadcast %c124_i32 : i32 to vector<1x128xi32>
    %160 = arith.cmpi slt, %9, %159 : vector<1x128xi32>
    %cst_50 = arith.constant 1.000000e+00 : f32
    %cst_51 = arith.constant 0.000000e+00 : f32
    %161 = vector.broadcast %cst_50 : f32 to vector<1x128xf32>
    %162 = vector.broadcast %cst_51 : f32 to vector<1x128xf32>
    %163 = arith.select %160, %161, %162 : vector<1x128xi1>, vector<1x128xf32>
    %c60_i32 = arith.constant 60 : i32
    %164 = vector.broadcast %c60_i32 : i32 to vector<64x1xi32>
    %165 = arith.cmpi slt, %8, %164 : vector<64x1xi32>
    %cst_52 = arith.constant 1.000000e+00 : f32
    %cst_53 = arith.constant 0.000000e+00 : f32
    %166 = vector.broadcast %cst_52 : f32 to vector<64x1xf32>
    %167 = vector.broadcast %cst_53 : f32 to vector<64x1xf32>
    %168 = arith.select %165, %166, %167 : vector<64x1xi1>, vector<64x1xf32>
    %169 = arith.mulf %154, %163 : vector<1x128xf32>
    %170 = arith.mulf %147, %168 : vector<64x1xf32>
    %171 = vector.broadcast %154 : vector<1x128xf32> to vector<64x128xf32>
    %172 = arith.mulf %156, %171 : vector<64x128xf32>
    %173 = vector.shape_cast %172 : vector<64x128xf32> to vector<1x64x128xf32>
    %cst_54 = arith.constant dense<0.000000e+00> : vector<1xf32>
    %174 = vector.multi_reduction <add>, %173, %cst_54 [1, 2] : vector<1x64x128xf32> to vector<1xf32>
    %175 = vector.shape_cast %174 : vector<1xf32> to vector<1x1x1xf32>
    %176 = vector.extract %175[0, 0, 0] : f32 from vector<1x1x1xf32>
    %177 = vector.broadcast %176 : f32 to vector<1x1xf32>
    %c124_i32_55 = arith.constant 124 : i32
    %178 = tpu.dynamic_rotate %7 by %c124_i32_55 dim 1 : vector<64x128xf32>, i32 -> vector<64x128xf32>
    %c124_i32_56 = arith.constant 124 : i32
    %179 = tpu.dynamic_rotate %5 by %c124_i32_56 dim 1 : vector<64x128xf32>, i32 -> vector<64x128xf32>
    %180 = arith.subf %178, %7 : vector<64x128xf32>
    %181 = math.absf %180 : vector<64x128xf32>
    %182 = arith.mulf %179, %156 : vector<64x128xf32>
    %183 = arith.mulf %181, %182 : vector<64x128xf32>
    %184 = vector.broadcast %169 : vector<1x128xf32> to vector<64x128xf32>
    %185 = arith.mulf %183, %184 : vector<64x128xf32>
    %186 = vector.shape_cast %185 : vector<64x128xf32> to vector<1x64x128xf32>
    %cst_57 = arith.constant dense<0.000000e+00> : vector<1xf32>
    %187 = vector.multi_reduction <add>, %186, %cst_57 [1, 2] : vector<1x64x128xf32> to vector<1xf32>
    %188 = vector.shape_cast %187 : vector<1xf32> to vector<1x1x1xf32>
    %189 = vector.extract %188[0, 0, 0] : f32 from vector<1x1x1xf32>
    %190 = vector.broadcast %189 : f32 to vector<1x1xf32>
    %c60_i32_58 = arith.constant 60 : i32
    %191 = tpu.dynamic_rotate %7 by %c60_i32_58 dim 0 : vector<64x128xf32>, i32 -> vector<64x128xf32>
    %c60_i32_59 = arith.constant 60 : i32
    %192 = tpu.dynamic_rotate %5 by %c60_i32_59 dim 0 : vector<64x128xf32>, i32 -> vector<64x128xf32>
    %193 = arith.subf %191, %7 : vector<64x128xf32>
    %194 = math.absf %193 : vector<64x128xf32>
    %195 = arith.mulf %192, %158 : vector<64x128xf32>
    %196 = arith.mulf %194, %195 : vector<64x128xf32>
    %197 = vector.broadcast %170 : vector<64x1xf32> to vector<64x128xf32>
    %198 = arith.mulf %196, %197 : vector<64x128xf32>
    %199 = vector.shape_cast %198 : vector<64x128xf32> to vector<1x64x128xf32>
    %cst_60 = arith.constant dense<0.000000e+00> : vector<1xf32>
    %200 = vector.multi_reduction <add>, %199, %cst_60 [1, 2] : vector<1x64x128xf32> to vector<1xf32>
    %201 = vector.shape_cast %200 : vector<1xf32> to vector<1x1x1xf32>
    %202 = vector.extract %201[0, 0, 0] : f32 from vector<1x1x1xf32>
    %203 = vector.broadcast %202 : f32 to vector<1x1xf32>
    %204 = arith.addf %190, %203 : vector<1x1xf32>
    %c2_i32 = arith.constant 2 : i32
    %205 = vector.broadcast %c2_i32 : i32 to vector<1x4xi32>
    %206 = arith.cmpi eq, %10, %205 : vector<1x4xi32>
    %cst_61 = arith.constant 1.000000e+00 : f32
    %cst_62 = arith.constant 0.000000e+00 : f32
    %207 = vector.broadcast %cst_61 : f32 to vector<1x4xf32>
    %208 = vector.broadcast %cst_62 : f32 to vector<1x4xf32>
    %209 = arith.select %206, %207, %208 : vector<1x4xi1>, vector<1x4xf32>
    %210 = vector.broadcast %204 : vector<1x1xf32> to vector<1x4xf32>
    %211 = arith.mulf %210, %209 : vector<1x4xf32>
    %212 = arith.addf %137, %211 : vector<1x4xf32>
    %213 = vector.broadcast %177 : vector<1x1xf32> to vector<1x4xf32>
    %214 = arith.mulf %213, %209 : vector<1x4xf32>
    %215 = arith.addf %140, %214 : vector<1x4xf32>
    %c7_i32 = arith.constant 7 : i32
    %216 = vector.broadcast %c7_i32 : i32 to vector<64x1xi32>
    %217 = arith.andi %8, %216 : vector<64x1xi32>
    %c0_i32_63 = arith.constant 0 : i32
    %218 = vector.broadcast %c0_i32_63 : i32 to vector<64x1xi32>
    %219 = arith.cmpi eq, %217, %218 : vector<64x1xi32>
    %cst_64 = arith.constant 1.000000e+00 : f32
    %cst_65 = arith.constant 0.000000e+00 : f32
    %220 = vector.broadcast %cst_64 : f32 to vector<64x1xf32>
    %221 = vector.broadcast %cst_65 : f32 to vector<64x1xf32>
    %222 = arith.select %219, %220, %221 : vector<64x1xi1>, vector<64x1xf32>
    %c7_i32_66 = arith.constant 7 : i32
    %223 = vector.broadcast %c7_i32_66 : i32 to vector<1x128xi32>
    %224 = arith.andi %9, %223 : vector<1x128xi32>
    %c0_i32_67 = arith.constant 0 : i32
    %225 = vector.broadcast %c0_i32_67 : i32 to vector<1x128xi32>
    %226 = arith.cmpi eq, %224, %225 : vector<1x128xi32>
    %cst_68 = arith.constant 1.000000e+00 : f32
    %cst_69 = arith.constant 0.000000e+00 : f32
    %227 = vector.broadcast %cst_68 : f32 to vector<1x128xf32>
    %228 = vector.broadcast %cst_69 : f32 to vector<1x128xf32>
    %229 = arith.select %226, %227, %228 : vector<1x128xi1>, vector<1x128xf32>
    %230 = vector.broadcast %222 : vector<64x1xf32> to vector<64x128xf32>
    %231 = arith.mulf %5, %230 : vector<64x128xf32>
    %232 = vector.broadcast %229 : vector<1x128xf32> to vector<64x128xf32>
    %233 = arith.mulf %5, %232 : vector<64x128xf32>
    %c120_i32 = arith.constant 120 : i32
    %234 = vector.broadcast %c120_i32 : i32 to vector<1x128xi32>
    %235 = arith.cmpi slt, %9, %234 : vector<1x128xi32>
    %cst_70 = arith.constant 1.000000e+00 : f32
    %cst_71 = arith.constant 0.000000e+00 : f32
    %236 = vector.broadcast %cst_70 : f32 to vector<1x128xf32>
    %237 = vector.broadcast %cst_71 : f32 to vector<1x128xf32>
    %238 = arith.select %235, %236, %237 : vector<1x128xi1>, vector<1x128xf32>
    %c56_i32 = arith.constant 56 : i32
    %239 = vector.broadcast %c56_i32 : i32 to vector<64x1xi32>
    %240 = arith.cmpi slt, %8, %239 : vector<64x1xi32>
    %cst_72 = arith.constant 1.000000e+00 : f32
    %cst_73 = arith.constant 0.000000e+00 : f32
    %241 = vector.broadcast %cst_72 : f32 to vector<64x1xf32>
    %242 = vector.broadcast %cst_73 : f32 to vector<64x1xf32>
    %243 = arith.select %240, %241, %242 : vector<64x1xi1>, vector<64x1xf32>
    %244 = arith.mulf %229, %238 : vector<1x128xf32>
    %245 = arith.mulf %222, %243 : vector<64x1xf32>
    %246 = vector.broadcast %229 : vector<1x128xf32> to vector<64x128xf32>
    %247 = arith.mulf %231, %246 : vector<64x128xf32>
    %248 = vector.shape_cast %247 : vector<64x128xf32> to vector<1x64x128xf32>
    %cst_74 = arith.constant dense<0.000000e+00> : vector<1xf32>
    %249 = vector.multi_reduction <add>, %248, %cst_74 [1, 2] : vector<1x64x128xf32> to vector<1xf32>
    %250 = vector.shape_cast %249 : vector<1xf32> to vector<1x1x1xf32>
    %251 = vector.extract %250[0, 0, 0] : f32 from vector<1x1x1xf32>
    %252 = vector.broadcast %251 : f32 to vector<1x1xf32>
    %c120_i32_75 = arith.constant 120 : i32
    %253 = tpu.dynamic_rotate %7 by %c120_i32_75 dim 1 : vector<64x128xf32>, i32 -> vector<64x128xf32>
    %c120_i32_76 = arith.constant 120 : i32
    %254 = tpu.dynamic_rotate %5 by %c120_i32_76 dim 1 : vector<64x128xf32>, i32 -> vector<64x128xf32>
    %255 = arith.subf %253, %7 : vector<64x128xf32>
    %256 = math.absf %255 : vector<64x128xf32>
    %257 = arith.mulf %254, %231 : vector<64x128xf32>
    %258 = arith.mulf %256, %257 : vector<64x128xf32>
    %259 = vector.broadcast %244 : vector<1x128xf32> to vector<64x128xf32>
    %260 = arith.mulf %258, %259 : vector<64x128xf32>
    %261 = vector.shape_cast %260 : vector<64x128xf32> to vector<1x64x128xf32>
    %cst_77 = arith.constant dense<0.000000e+00> : vector<1xf32>
    %262 = vector.multi_reduction <add>, %261, %cst_77 [1, 2] : vector<1x64x128xf32> to vector<1xf32>
    %263 = vector.shape_cast %262 : vector<1xf32> to vector<1x1x1xf32>
    %264 = vector.extract %263[0, 0, 0] : f32 from vector<1x1x1xf32>
    %265 = vector.broadcast %264 : f32 to vector<1x1xf32>
    %c56_i32_78 = arith.constant 56 : i32
    %266 = tpu.dynamic_rotate %7 by %c56_i32_78 dim 0 : vector<64x128xf32>, i32 -> vector<64x128xf32>
    %c56_i32_79 = arith.constant 56 : i32
    %267 = tpu.dynamic_rotate %5 by %c56_i32_79 dim 0 : vector<64x128xf32>, i32 -> vector<64x128xf32>
    %268 = arith.subf %266, %7 : vector<64x128xf32>
    %269 = math.absf %268 : vector<64x128xf32>
    %270 = arith.mulf %267, %233 : vector<64x128xf32>
    %271 = arith.mulf %269, %270 : vector<64x128xf32>
    %272 = vector.broadcast %245 : vector<64x1xf32> to vector<64x128xf32>
    %273 = arith.mulf %271, %272 : vector<64x128xf32>
    %274 = vector.shape_cast %273 : vector<64x128xf32> to vector<1x64x128xf32>
    %cst_80 = arith.constant dense<0.000000e+00> : vector<1xf32>
    %275 = vector.multi_reduction <add>, %274, %cst_80 [1, 2] : vector<1x64x128xf32> to vector<1xf32>
    %276 = vector.shape_cast %275 : vector<1xf32> to vector<1x1x1xf32>
    %277 = vector.extract %276[0, 0, 0] : f32 from vector<1x1x1xf32>
    %278 = vector.broadcast %277 : f32 to vector<1x1xf32>
    %279 = arith.addf %265, %278 : vector<1x1xf32>
    %c3_i32_81 = arith.constant 3 : i32
    %280 = vector.broadcast %c3_i32_81 : i32 to vector<1x4xi32>
    %281 = arith.cmpi eq, %10, %280 : vector<1x4xi32>
    %cst_82 = arith.constant 1.000000e+00 : f32
    %cst_83 = arith.constant 0.000000e+00 : f32
    %282 = vector.broadcast %cst_82 : f32 to vector<1x4xf32>
    %283 = vector.broadcast %cst_83 : f32 to vector<1x4xf32>
    %284 = arith.select %281, %282, %283 : vector<1x4xi1>, vector<1x4xf32>
    %285 = vector.broadcast %279 : vector<1x1xf32> to vector<1x4xf32>
    %286 = arith.mulf %285, %284 : vector<1x4xf32>
    %287 = arith.addf %212, %286 : vector<1x4xf32>
    %288 = vector.broadcast %252 : vector<1x1xf32> to vector<1x4xf32>
    %289 = arith.mulf %288, %284 : vector<1x4xf32>
    %290 = arith.addf %215, %289 : vector<1x4xf32>
    %291 = vector.shape_cast %287 : vector<1x4xf32> to vector<1x1x4xf32>
    %c0_84 = arith.constant 0 : index
    %c0_85 = arith.constant 0 : index
    %c0_86 = arith.constant 0 : index
    %292 = vector.load %arg5[%c0_84, %c0_85, %c0_86] : memref<1x1x4xf32, #tpu.memory_space<vmem>>, vector<1x1x4xf32>
    tpu.vector_store %arg5[%c0_84, %c0_85, %c0_86], %291 {strides = array<i32>} : memref<1x1x4xf32, #tpu.memory_space<vmem>>, vector<1x1x4xf32>,
    %293 = vector.shape_cast %290 : vector<1x4xf32> to vector<1x1x4xf32>
    %c0_87 = arith.constant 0 : index
    %c0_88 = arith.constant 0 : index
    %c0_89 = arith.constant 0 : index
    %294 = vector.load %arg6[%c0_87, %c0_88, %c0_89] : memref<1x1x4xf32, #tpu.memory_space<vmem>>, vector<1x1x4xf32>
    tpu.vector_store %arg6[%c0_87, %c0_88, %c0_89], %293 {strides = array<i32>} : memref<1x1x4xf32, #tpu.memory_space<vmem>>, vector<1x1x4xf32>,
    return
  }
  func.func @transform_0(%arg0: i32, %arg1: i32) -> (i32, i32, i32) {
    %c0_i32 = arith.constant 0 : i32
    %c0_i32_0 = arith.constant 0 : i32
    return %arg0, %arg1, %c0_i32 : i32, i32, i32
  }
  func.func @transform_1(%arg0: i32, %arg1: i32) -> (i32, i32, i32) {
    %c0_i32 = arith.constant 0 : i32
    %c0_i32_0 = arith.constant 0 : i32
    return %arg0, %arg1, %c0_i32 : i32, i32, i32
  }
  func.func @transform_2(%arg0: i32, %arg1: i32) -> (i32, i32, i32) {
    %c0_i32 = arith.constant 0 : i32
    %c0_i32_0 = arith.constant 0 : i32
    return %arg0, %arg1, %c0_i32 : i32, i32, i32
  }
  func.func @transform_3(%arg0: i32, %arg1: i32) -> (i32, i32, i32) {
    %c1_i32 = arith.constant 1 : i32
    %0 = arith.muli %arg0, %c1_i32 : i32
    %1 = arith.addi %0, %arg1 : i32
    %c0_i32 = arith.constant 0 : i32
    %c0_i32_0 = arith.constant 0 : i32
    %c0_i32_1 = arith.constant 0 : i32
    return %1, %c0_i32, %c0_i32_0 : i32, i32, i32
  }
  func.func @transform_4(%arg0: i32, %arg1: i32) -> (i32, i32, i32) {
    %c1_i32 = arith.constant 1 : i32
    %0 = arith.muli %arg0, %c1_i32 : i32
    %1 = arith.addi %0, %arg1 : i32
    %c0_i32 = arith.constant 0 : i32
    %c0_i32_0 = arith.constant 0 : i32
    %c0_i32_1 = arith.constant 0 : i32
    return %1, %c0_i32, %c0_i32_0 : i32, i32, i32
  }
}

</mosaic_0001>

<bundles_post_ra>
// kernel: gradient_loss.1
= control target key start
LH: loop header
LB: loop body
LE: loop exit
PB: predicated region body
PF: predicated region fallthrough
CT: control target
= control target key end

     0   :  { %s1658_s15 = smov 0   ;;  %s1660_s16 = smov 0   ;;  %s2790_s0 = inlined_call_operand.vmem [shape: f32[2,64,128], index: 0, kind: input, shape index: {}]   ;;  %s2791_s1 = inlined_call_operand.vmem [shape: f32[2,64,128], index: 1, kind: input, shape index: {}]   ;;  %s2792_s2 = inlined_call_operand.vmem [shape: f32[2,64,128], index: 2, kind: input, shape index: {}]   ;;  %s2793_s3 = inlined_call_operand.vmem [shape: f32[2,1,4], index: 3, kind: output, shape index: {0}]   ;;  %s2794_s4 = inlined_call_operand.vmem [shape: f32[2,1,4], index: 4, kind: output, shape index: {1}]  }
   0x1   :  { %s1662_s17 = smov 0  }
   0x2 LB: > { %s27_s18 = sadd.s32 1, %s1622_s16  ;;  %p1531_p0 = scmp.ge.s32.totalorder %s1626_s17, 1  ;;  %s1626_s17 = sphi %s1662_s17, %s15_s17   ;;  %s1622_s16 = sphi %s1660_s16, %s2966_s16   ;;  %s1618_s15 = sphi %s1658_s15, %s2965_s15  }
   0x3   : > { %p29_p1 = scmp.ge.s32.totalorder %s27_s18, 2  ;;  %p222_p2 = scmp.lt.s32.totalorder %s1626_s17, 3 }
   0x5   : > { %s2968_s18 = smov (%p29_p1, %s27_s18), 0  ;;  %p223_p3 = pnand %p1531_p0, %p222_p2 }
   0x7   : > { %226 = sbr.rel (%p223_p3) target bundleno = 632 (0x278), region = 32 }
   0xc   : > { %p274_p4 = scmp.lt.s32.totalorder %s1618_s15, 1  ;;  %s1628_s29 = smov 127   ;;  %v353_v43 = vlaneseq }
   0xd   : > { %s1629_s30 = smov 126   ;;  %s1631_s5 = smov 124  }
   0xe   : > { %s2970_s15 = smov (!%p274_p4, %s1618_s15), 1  ;;  %v1782_v45 = vshrl.u32 %v353_v43, 7  ;;  %s1632_s6 = smov 120  }
   0xf   : > { %s1540_s19 = sshll.u32 %s2970_s15, 6  ;;  %s311_s23 = scalar_lea.vmem %s2794_s4, %s2970_s15 }
  0x10   : > { %s1682_s22 = scalar_lea.vmem %s2790_s0, %s1540_s19  ;;  %s1687_s25 = scalar_lea.vmem %s2791_s1, %s1540_s19  ;;  %vm495_vm0 = vcmp.lt.s32.totalorder %v1782_v45, 7 }
  0x11   : > { %s1692_s28 = scalar_lea.vmem %s2792_s2, %s1540_s19  ;;  %v316_v0 = vld [vmem:[%s1682_s22 + $0x18] sm:$0xff]  ;;  %v313_v3 = vld [vmem:[%s1682_s22] sm:$0xff]  ;;  %v314_v11 = vld [vmem:[%s1682_s22 + $0x8] sm:$0xff] }
  0x12   : > { %v324_v1 = vld [vmem:[%s1687_s25 + $0x18] sm:$0xff]  ;;  %v1701_v5 = vld [vmem:[%s1692_s28] sm:$0xff]  ;;  %v1711_v12 = vld [vmem:[%s1692_s28 + $0x8] sm:$0xff] }
  0x13   : > { %v340_v2 = vsub.f32 %v316_v0, %v324_v1  ;;  %v1698_v4 = vld [vmem:[%s1692_s28 + $0x18] sm:$0xff]  ;;  %2847 = vst [vmem:[#allocation2_spill] sm:$0xff] %v1701_v5  ;;  %v321_v7 = vld [vmem:[%s1687_s25] sm:$0xff]  ;;  %v322_v14 = vld [vmem:[%s1687_s25 + $0x8] sm:$0xff]  ;;  %v382_v34 = vadd.f32 %v1711_v12, %v1701_v5  ;;  %v504_v54 = vrot.slane %v1701_v5, 1  ;;  %v505_v55 = vrot.slane %v1711_v12, 1 }
  0x14   : > { %v337_v8 = vsub.f32 %v313_v3, %v321_v7  ;;  %v317_v9 = vld [vmem:[%s1682_s22 + $0x20] sm:$0xff]  ;;  %v338_v17 = vsub.f32 %v314_v11, %v322_v14  ;;  %v315_v18 = vld [vmem:[%s1682_s22 + $0x10] sm:$0xff]  ;;  %v318_v29 = vld [vmem:[%s1682_s22 + $0x28] sm:$0xff]  ;;  %v507_v62 = vrot.slane %v1698_v4, 1 }
  0x15   : > { %v1704_v6 = vmul.f32 %v340_v2, %v1698_v4  ;;  %v325_v10 = vld [vmem:[%s1687_s25 + $0x20] sm:$0xff]  ;;  %v323_v19 = vld [vmem:[%s1687_s25 + $0x10] sm:$0xff]  ;;  %v326_v30 = vld [vmem:[%s1687_s25 + $0x28] sm:$0xff]  ;;  %v518_v0 = vsel %vm495_vm0, %v504_v54, %v505_v55 }
  0x16   : > { %v341_v13 = vsub.f32 %v317_v9, %v325_v10  ;;  %v1717_v15 = vld [vmem:[%s1692_s28 + $0x20] sm:$0xff]  ;;  %v1720_v16 = vmul.f32 %v337_v8, %v1701_v5  ;;  %v1727_v20 = vmul.f32 %v338_v17, %v1711_v12  ;;  %v319_v22 = vld [vmem:[%s1682_s22 + $0x30] sm:$0xff]  ;;  %v339_v24 = vsub.f32 %v315_v18, %v323_v19  ;;  %v1755_v33 = vld [vmem:[%s1692_s28 + $0x28] sm:$0xff] }
  0x17   : > { %404 = vrot.lane.b32.xlu2 %v1704_v6, %s1628_s29  ;;  %v327_v23 = vld [vmem:[%s1687_s25 + $0x30] sm:$0xff]  ;;  %v342_v32 = vsub.f32 %v318_v29, %v326_v30  ;;  %v320_v36 = vld [vmem:[%s1682_s22 + $0x38] sm:$0xff]  ;;  %v490_v51 = vrot.slane %v1704_v6, 1  ;;  %v536_v9 = vmul.f32 %v518_v0, %v1701_v5  ;;  %v508_v11 = vrot.slane %v1717_v15, 1 }
  0x18   : > { %2848 = vst [vmem:[#allocation3_spill] sm:$0xff] %v1720_v16  ;;  %398 = vrot.lane.b32.xlu0 %v1720_v16, %s1628_s29  ;;  %v1730_v21 = vmul.f32 %v341_v13, %v1717_v15  ;;  %400 = vrot.lane.b32.xlu1 %v1727_v20, %s1628_s29  ;;  %v1737_v25 = vld [vmem:[%s1692_s28 + $0x10] sm:$0xff]  ;;  %v343_v26 = vsub.f32 %v319_v22, %v327_v23  ;;  %v328_v37 = vld [vmem:[%s1687_s25 + $0x38] sm:$0xff]  ;;  %v487_v47 = vrot.slane %v1720_v16, 1  ;;  %v488_v48 = vrot.slane %v1727_v20, 1 }
  0x19   : > { %v1742_v27 = vld [vmem:[%s1692_s28 + $0x30] sm:$0xff]  ;;  %v1745_v28 = vmul.f32 %v339_v24, %v1737_v25  ;;  %v1762_v35 = vmul.f32 %v342_v32, %v1755_v33  ;;  %v383_v38 = vadd.f32 %v382_v34, %v1737_v25  ;;  %v344_v39 = vsub.f32 %v320_v36, %v328_v37  ;;  %v1770_v40 = vld [vmem:[%s1692_s28 + $0x38] sm:$0xff] }
  0x1a   : > { %2849 = vst [vmem:[#allocation4_spill] sm:$0xff] %v1742_v27  ;;  %v1750_v31 = vmul.f32 %v343_v26, %v1742_v27  ;;  %v502_v52 = vsel %vm495_vm0, %v487_v47, %v488_v48  ;;  %v506_v56 = vrot.slane %v1737_v25, 1  ;;  %v491_v58 = vrot.slane %v1730_v21, 1 }
  0x1b   : > { %v384_v41 = vadd.f32 %v383_v38, %v1698_v4  ;;  %v1776_v42 = vmul.f32 %v344_v39, %v1770_v40  ;;  %v489_v49 = vrot.slane %v1745_v28, 1  ;;  %v520_v57 = vsub.f32 %v502_v52, %v1720_v16 }
  0x1c   : > { %v517_v63 = vsel %vm495_vm0, %v505_v55, %v506_v56  ;;  %v492_v1 = vrot.slane %v1762_v35, 1  ;;  %v499_v7 = vsel %vm495_vm0, %v490_v51, %v491_v58  ;;  %v516_v13 = vsel %vm495_vm0, %v506_v56, %v507_v62 }
  0x1d   : > { %v385_v44 = vadd.f32 %v384_v41, %v1717_v15  ;;  %v501_v53 = vsel %vm495_vm0, %v488_v48, %v489_v49  ;;  %v500_v59 = vsel %vm495_vm0, %v489_v49, %v490_v51  ;;  %v528_v3 = vand.u32 2147483647, %v520_v57 }
  0x1e   : > { %v521_v60 = vsub.f32 %v501_v53, %v1727_v20  ;;  %v522_v2 = vsub.f32 %v500_v59, %v1745_v28  ;;  %v537_v10 = vmul.f32 %v517_v63, %v1711_v12  ;;  %v493_v14 = vrot.slane %v1750_v31, 1 }
  0x1f   : > { %406 = vrot.lane.b32.xlu2 %v1730_v21, %s1628_s29  ;;  %v386_v46 = vadd.f32 %v385_v44, %v1755_v33  ;;  %v498_v17 = vsel %vm495_vm0, %v491_v58, %v492_v1  ;;  %v523_v18 = vsub.f32 %v499_v7, %v1704_v6  ;;  %v509_v22 = vrot.slane %v1755_v33, 1 }
  0x20   : > { %402 = vrot.lane.b32.xlu1 %v1745_v28, %s1628_s29  ;;  %v529_v8 = vand.u32 2147483647, %v521_v60  ;;  %v530_v19 = vand.u32 2147483647, %v522_v2  ;;  %v538_v23 = vmul.f32 %v516_v13, %v1737_v25  ;;  %v544_v24 = vmul.f32 %v536_v9, %v528_v3 }
  0x21   : > { %v387_v50 = vadd.f32 %v386_v46, %v1742_v27  ;;  %v515_v29 = vsel %vm495_vm0, %v507_v62, %v508_v11  ;;  %v494_v30 = vrot.slane %v1776_v42, 1  ;;  %v497_v32 = vsel %vm495_vm0, %v492_v1, %v493_v14 }
  0x22   : > { %v545_v26 = vmul.f32 %v537_v10, %v529_v8  ;;  %v524_v34 = vsub.f32 %v498_v17, %v1730_v21  ;;  %v531_v36 = vand.u32 2147483647, %v523_v18  ;;  %v514_v37 = vsel %vm495_vm0, %v508_v11, %v509_v22 }
  0x23   : > { %v388_v61 = vadd.f32 %v387_v50, %v1770_v40  ;;  %v539_v38 = vmul.f32 %v515_v29, %v1698_v4  ;;  %v546_v39 = vmul.f32 %v538_v23, %v530_v19  ;;  %v510_v44 = vrot.slane %v1742_v27, 1 }
  0x24   : > { %v560_v41 = vadd.f32 %v545_v26, %v544_v24  ;;  %v525_v46 = vsub.f32 %v497_v32, %v1762_v35  ;;  %v532_v48 = vand.u32 2147483647, %v524_v34  ;;  %v540_v49 = vmul.f32 %v514_v37, %v1717_v15 }
  0x25   : > { %v496_v50 = vsel %vm495_vm0, %v493_v14, %v494_v30  ;;  %v503_v51 = vsel %vm495_vm0, %v494_v30, %v487_v47  ;;  %v547_v52 = vmul.f32 %v539_v38, %v531_v36  ;;  %v511_v55 = vrot.slane %v1770_v40, 1 }
  0x26   : > { %v561_v53 = vadd.f32 %v560_v41, %v546_v39  ;;  %v513_v56 = vsel %vm495_vm0, %v509_v22, %v510_v44  ;;  %v526_v57 = vsub.f32 %v496_v50, %v1750_v31  ;;  %v527_v58 = vsub.f32 %v503_v51, %v1776_v42 }
  0x27   : > { %410 = vrot.lane.b32.xlu2 %v1750_v31, %s1628_s29  ;;  %v533_v59 = vand.u32 2147483647, %v525_v46  ;;  %v541_v60 = vmul.f32 %v513_v56, %v1755_v33  ;;  %v512_v63 = vsel %vm495_vm0, %v510_v44, %v511_v55  ;;  %v519_v47 = vsel %vm495_vm0, %v511_v55, %v504_v54 }
  0x28   : > { %408 = vrot.lane.b32.xlu1 %v1762_v35, %s1628_s29  ;;  %v562_v62 = vadd.f32 %v561_v53, %v547_v52  ;;  %v1863_v0 = vadd.s32 56, %v1782_v45  ;;  %v534_v1 = vand.u32 2147483647, %v526_v57  ;;  %v535_v2 = vand.u32 2147483647, %v527_v58 }
  0x29   : > { %v542_v3 = vmul.f32 %v512_v63, %v1742_v27  ;;  %v543_v7 = vmul.f32 %v519_v47, %v1770_v40  ;;  %v549_v8 = vmul.f32 %v541_v60, %v533_v59  ;;  %v2799_v13 = vmov 0.0  }
  0x2a   : > { %2850 = vst [vmem:[#allocation5_spill] sm:$0xff] %v1863_v0  ;;  %vm373_vm1 = vcmp.lt.s32.totalorder %v1863_v0, 63  ;;  %v1876_v19 = vadd.s32 8, %v1782_v45  ;;  %v1879_v23 = vand.u32 127, %v353_v43  ;;  %v1882_v24 = vadd.s32 16, %v1782_v45 }
  0x2b   : > { %v550_v54 = vmul.f32 %v542_v3, %v534_v1  ;;  %v551_v10 = vmul.f32 %v543_v7, %v535_v2  ;;  %v381_v14 = vsel %vm373_vm1, 1.0, %v2799_v13  ;;  %v585_v26 = vand.u32 1, %v1782_v45 }
  0x2c   : > { %2851 = vst [vmem:[#allocation6_spill] sm:$0xff] %v1879_v23  ;;  %v586_v29 = vand.u32 1, %v1876_v19  ;;  %v1889_v30 = vadd.s32 24, %v1782_v45  ;;  %v587_v43 = vand.u32 1, %v1882_v24  ;;  %v609_v32 = vand.u32 1, %v1879_v23 }
  0x2d   : > { %v559_v17 = vmul.f32 %v551_v10, %v381_v14  ;;  %vm593_vm2 = vcmp.eq.s32.totalorder %v585_v26, 0  ;;  %v1902_v37 = vadd.s32 32, %v1782_v45  ;;  %v1937_v55 = vadd.s32 48, %v1782_v45 }
  0x2e   : > { %2852 = vst [vmem:[#allocation7_spill] sm:$0xff] %v1889_v30  ;;  %vm594_vm3 = vcmp.eq.s32.totalorder %v586_v29, 0  ;;  %v1896_v34 = vsel %vm593_vm2, 1.0, %v2799_v13  ;;  %v588_v38 = vand.u32 1, %v1889_v30  ;;  %vm595_vm4 = vcmp.eq.s32.totalorder %v587_v43, 0 }
  0x2f   : > { %414 = vrot.lane.b32.xlu2 %v1701_v5, %s1628_s29  ;;  %2853 = vst [vmem:[#allocation8_spill] sm:$0xff] %v1896_v34  ;;  %v1899_v36 = vsel %vm594_vm3, 1.0, %v2799_v13  ;;  %vm610_vm5 = vcmp.eq.s32.totalorder %v609_v32, 0  ;;  %v1909_v39 = vmul.f32 %v1896_v34, %v1701_v5  ;;  %v1916_v44 = vsel %vm595_vm4, 1.0, %v2799_v13 }
  0x30   : > { %412 = vrot.lane.b32.xlu1 %v1776_v42, %s1628_s29  ;;  %2854 = vst [vmem:[#allocation9_spill] sm:$0xff] %v1899_v36  ;;  %v1913_v41 = vmul.f32 %v1899_v36, %v1711_v12  ;;  %v1919_v46 = vsel %vm610_vm5, 1.0, %v2799_v13  ;;  %vm596_vm6 = vcmp.eq.s32.totalorder %v588_v38, 0  ;;  %v1927_v50 = vmul.f32 %v1916_v44, %v1737_v25 }
  0x31   : > { %2855 = vst [vmem:[#allocation10_spill] sm:$0xff] %v1902_v37  ;;  %v655_v51 = vmul.f32 %v1909_v39, %v1919_v46  ;;  %v1934_v53 = vsel %vm596_vm6, 1.0, %v2799_v13  ;;  %v592_v2 = vand.u32 1, %v1863_v0  ;;  %vm364_vm11 = vcmp.lt.s32.totalorder %v1879_v23, 127 }
  0x32   : > { %2856 = vst [vmem:[#allocation11_spill] sm:$0xff] %v1916_v44  ;;  %v656_v52 = vmul.f32 %v1913_v41, %v1919_v46  ;;  %v1944_v57 = vmul.f32 %v1934_v53, %v1698_v4  ;;  %v657_v58 = vmul.f32 %v1927_v50, %v1919_v46  ;;  %vm628_vm12 = vcmp.lt.s32.totalorder %v1879_v23, 126 }
  0x33   : > { %2857 = vst [vmem:[#allocation12_spill] sm:$0xff] %v1919_v46  ;;  %vm600_vm10 = vcmp.eq.s32.totalorder %v592_v2, 0  ;;  %vm909_vm14 = vcmp.lt.s32.totalorder %v1879_v23, 124  ;;  %vm1057_vm1 = vcmp.lt.s32.totalorder %v1782_v45, 4  ;;  %v2871_v44 = vrot.slane %v1727_v20, 4 }
  0x34   : > { %2858 = vst [vmem:[#allocation13_spill] sm:$0xff] %v1934_v53  ;;  %v663_v59 = vadd.f32 %v656_v52, %v655_v51  ;;  %v658_v63 = vmul.f32 %v1944_v57, %v1919_v46  ;;  %v1980_v14 = vsel %vm600_vm10, 1.0, %v2799_v13  ;;  %v1148_v0 = vand.u32 7, %v1876_v19 }
  0x35   : > { %2859 = vst [vmem:[#allocation14_spill] sm:$0xff] %v1937_v55  ;;  %vm1190_vm6 = vcmp.lt.s32.totalorder %v1879_v23, 120 }
  0x36   : > { %v664_v47 = vadd.f32 %v663_v59, %v657_v58  ;;  %2865 = vst [vmem:[#allocation20_spill] sm:$0xff] %v1980_v14  ;;  %vm1156_vm4 = vcmp.eq.s32.totalorder %v1148_v0, 0  ;;  %v1150_v0 = vand.u32 7, %v1889_v30 }
  0x37   : > { %420 = vrot.lane.b32.xlu2 %v1698_v4, %s1628_s29 }
  0x38   : > { %418 = vrot.lane.b32.xlu1 %v1737_v25, %s1628_s29  ;;  %vm1158_vm5 = vcmp.eq.s32.totalorder %v1150_v0, 0  ;;  %v2819_v0 = vrot.slane %v1701_v5, 4 }
  0x3f   : > { %426 = vrot.lane.b32.xlu2 %v1742_v27, %s1628_s29 }
  0x40   : > { %424 = vrot.lane.b32.xlu1 %v1755_v33, %s1628_s29 }
  0x42   : > { %389 = vadd.xlane.f32.xlu0 %v388_v61  ;;  %v548_v61 = vmul.f32 %v540_v49, %v532_v48  ;;  %v1922_v48 = vadd.s32 40, %v1782_v45  ;;  %v589_v49 = vand.u32 1, %v1902_v37 }
  0x44   : > { %v563_v9 = vadd.f32 %v562_v62, %v548_v61  ;;  %v590_v56 = vand.u32 1, %v1922_v48  ;;  %vm597_vm7 = vcmp.eq.s32.totalorder %v589_v49, 0  ;;  %v591_v61 = vand.u32 1, %v1937_v55 }
  0x45   : > { %v1949_v60 = vsel %vm597_vm7, 1.0, %v2799_v13 }
  0x46   : > { %v564_v11 = vadd.f32 %v563_v9, %v549_v8  ;;  %2860 = vst [vmem:[#allocation15_spill] sm:$0xff] %v1949_v60  ;;  %vm598_vm8 = vcmp.eq.s32.totalorder %v590_v56, 0  ;;  %v1954_v62 = vmul.f32 %v1949_v60, %v1717_v15  ;;  %vm599_vm9 = vcmp.eq.s32.totalorder %v591_v61, 0 }
  0x47   : > { %v1959_v1 = vsel %vm598_vm8, 1.0, %v2799_v13  ;;  %v665_v8 = vadd.f32 %v664_v47, %v658_v63  ;;  %v1969_v9 = vsel %vm599_vm9, 1.0, %v2799_v13  ;;  %v1068_v60 = vrot.slane %v1737_v25, 4 }
  0x48   : > { %681 = vrot.lane.b32.xlu1 %v1727_v20, %s1629_s30  ;;  %v565_v18 = vadd.f32 %v564_v11, %v550_v54  ;;  %2861 = vst [vmem:[#allocation16_spill] sm:$0xff] %v1959_v1  ;;  %v1964_v3 = vmul.f32 %v1959_v1, %v1755_v33  ;;  %v659_v7 = vmul.f32 %v1954_v62, %v1919_v46 }
  0x49   : > { %2863 = vst [vmem:[#allocation18_spill] sm:$0xff] %v1969_v9  ;;  %v1975_v54 = vmul.f32 %v1969_v9, %v1742_v27 }
  0x4a   : > { %v566_v22 = vadd.f32 %v565_v18, %v559_v17  ;;  %2862 = vst [vmem:[#allocation17_spill] sm:$0xff] %v1964_v3  ;;  %v660_v10 = vmul.f32 %v1964_v3, %v1919_v46  ;;  %v666_v11 = vadd.f32 %v665_v8, %v659_v7  ;;  %v1984_v17 = vmul.f32 %v1980_v14, %v1770_v40 }
  0x4b   : > { %2864 = vst [vmem:[#allocation19_spill] sm:$0xff] %v1975_v54  ;;  %v661_v18 = vmul.f32 %v1975_v54, %v1919_v46 }
  0x4c   : > { %2866 = vst [vmem:[#allocation21_spill] sm:$0xff] %v1984_v17  ;;  %v662_v26 = vmul.f32 %v1984_v17, %v1919_v46 }
  0x50   : > { %689 = vrot.lane.b32.xlu1 %v1762_v35, %s1629_s30 }
  0x56   : > { %416 = vrot.lane.b32.xlu0 %v1711_v12, %s1628_s29 }
  0x58   : > { %695 = vrot.lane.b32.xlu1 %v1701_v5, %s1629_s30 }
  0x5e   : > { %422 = vrot.lane.b32.xlu0 %v1717_v15, %s1628_s29 }
  0x60   : > { %701 = vrot.lane.b32.xlu1 %v1698_v4, %s1629_s30 }
  0x66   : > { %428 = vrot.lane.b32.xlu0 %v1770_v40, %s1628_s29 }
  0x68   : > { %567 = vadd.xlane.f32.xlu2 %v566_v22  ;;  %962 = vrot.lane.b32.xlu1 %v1727_v20, %s1631_s5  ;;  %v667_v22 = vadd.f32 %v666_v11, %v660_v10 }
  0x6a   : > { %v668_v29 = vadd.f32 %v667_v22, %v661_v18 }
  0x6c   : > { %v669_v43 = vadd.f32 %v668_v29, %v662_v26 }
  0x70   : > { %978 = vrot.lane.b32.xlu1 %v1711_v12, %s1631_s5 }
  0x71   : > { %v405_v49 = vpop.permute.xlu2 %404 }
  0x79   : > { %v407_v52 = vpop.permute.xlu2 %406 }
  0x80   : > { %679 = vrot.lane.b32.xlu2 %v1720_v16, %s1629_s30 }
  0x81   : > { %v411_v59 = vpop.permute.xlu2 %410 }
  0x88   : > { %685 = vrot.lane.b32.xlu2 %v1704_v6, %s1629_s30 }
  0x89   : > { %v415_v11 = vpop.permute.xlu2 %414 }
  0x8a   : > { %v401_v32 = vpop.permute.xlu1 %400  ;;  %v399_v56 = vpop.permute.xlu0 %398 }
  0x8b   : > { %v430_v22 = vsub.f32 %v399_v56, %v1720_v16 }
  0x8d   : > { %v438_v29 = vand.u32 2147483647, %v430_v22 }
  0x90   : > { %691 = vrot.lane.b32.xlu2 %v1750_v31, %s1629_s30  ;;  %670 = vadd.xlane.f32.xlu0 %v669_v43  ;;  %v446_v43 = vmul.f32 %v415_v11, %v1701_v5 }
  0x91   : > { %v421_v56 = vpop.permute.xlu2 %420 }
  0x92   : > { %v403_v38 = vpop.permute.xlu1 %402 }
  0x93   : > { %v432_v26 = vsub.f32 %v403_v38, %v1745_v28 }
  0x98   : > { %697 = vrot.lane.b32.xlu2 %v1711_v12, %s1629_s30 }
  0x9a   : > { %v409_v51 = vpop.permute.xlu1 %408 }
  0x9b   : > { %v435_v3 = vsub.f32 %v409_v51, %v1762_v35  ;;  %v427_v51 = vpop.permute.xlu2 %426 }
  0xa0   : > { %703 = vrot.lane.b32.xlu2 %v1717_v15, %s1629_s30 }
  0xa2   : > { %v2006_v58 = vpop.permute.xlu1 %412 }
  0xa4   : > { %683 = vrot.lane.b32.xlu0 %v1745_v28, %s1629_s30 }
  0xa8   : > { %964 = vrot.lane.b32.xlu2 %v1745_v28, %s1631_s5 }
  0xaa   : > { %v419_v8 = vpop.permute.xlu1 %418 }
  0xac   : > { %687 = vrot.lane.b32.xlu0 %v1730_v21, %s1629_s30 }
  0xb0   : > { %1241 = vrot.lane.b32.xlu2 %v1720_v16, %s1632_s6 }
  0xb2   : > { %v425_v38 = vpop.permute.xlu1 %424 }
  0xb4   : > { %693 = vrot.lane.b32.xlu0 %v1776_v42, %s1629_s30 }
  0xb5   : > { %v390_v61 = vpop.xlane.xlu0 %389 }
  0xb6   : > { %v391_v63 = vrot.slane %v390_v61, 4 }
  0xb8   : > { %980 = vrot.lane.b32.xlu2 %v1737_v25, %s1631_s5  ;;  %v392_v47 = vadd.f32 %v391_v63, %v390_v61  ;;  %v431_v61 = vsub.f32 %v401_v32, %v1727_v20  ;;  %v433_v63 = vsub.f32 %v405_v49, %v1704_v6  ;;  %v365_v32 = vsel %vm364_vm11, 1.0, %v2799_v13 }
  0xb9   : > { %v449_v49 = vmul.f32 %v421_v56, %v1698_v4  ;;  %v451_v56 = vmul.f32 %v425_v38, %v1755_v33 }
  0xba   : > { %v393_v2 = vrot.slane %v392_v47, 2  ;;  %v441_v11 = vand.u32 2147483647, %v433_v63 }
  0xbc   : > { %699 = vrot.lane.b32.xlu0 %v1737_v25, %s1629_s30  ;;  %v394_v7 = vadd.f32 %v393_v2, %v392_v47  ;;  %v440_v47 = vand.u32 2147483647, %v432_v26  ;;  %v448_v2 = vmul.f32 %v419_v8, %v1737_v25  ;;  %v434_v8 = vsub.f32 %v407_v52, %v1730_v21 }
  0xbe   : > { %v395_v10 = vrot.slane %v394_v7, 1  ;;  %v456_v9 = vmul.f32 %v448_v2, %v440_v47 }
  0xc0   : > { %1259 = vrot.lane.b32.xlu2 %v1711_v12, %s1632_s6  ;;  %v396_v18 = vadd.f32 %v395_v10, %v394_v7  ;;  %v454_v10 = vmul.f32 %v446_v43, %v438_v29  ;;  %v436_v29 = vsub.f32 %v411_v59, %v1750_v31  ;;  %v457_v43 = vmul.f32 %v449_v49, %v441_v11 }
  0xc1   : > { %v464_v63 = vmul.f32 %v456_v9, %v365_v32  ;;  %v452_v59 = vmul.f32 %v427_v51, %v1742_v27 }
  0xc2   : > { %1543 = vpush %v396_v18  ;;  %v439_v18 = vand.u32 2147483647, %v431_v61  ;;  %v462_v26 = vmul.f32 %v454_v10, %v365_v32  ;;  %v443_v61 = vand.u32 2147483647, %v435_v3  ;;  %v444_v10 = vand.u32 2147483647, %v436_v29 }
  0xc3   : > { %v437_v3 = vsub.f32 %v2006_v58, %v1776_v42 }
  0xc4   : > { %960 = vrot.lane.b32.xlu0 %v1720_v16, %s1631_s5  ;;  %v459_v13 = vmul.f32 %v451_v56, %v443_v61  ;;  %v460_v49 = vmul.f32 %v452_v59, %v444_v10 }
  0xc5   : > { %v445_v29 = vand.u32 2147483647, %v437_v3 }
  0xc6   : > { %v467_v38 = vmul.f32 %v459_v13, %v365_v32  ;;  %v468_v51 = vmul.f32 %v460_v49, %v365_v32  ;;  %v2867_v49 = vmov 0.0  }
  0xc8   : > { %1247 = vrot.lane.b32.xlu2 %v1704_v6, %s1632_s6  ;;  %v417_v7 = vpop.permute.xlu0 %416 }
  0xc9   : > { %v447_v22 = vmul.f32 %v417_v7, %v1711_v12  ;;  %v682_v7 = vpop.permute.xlu1 %681 }
  0xcb   : > { %v455_v1 = vmul.f32 %v447_v22, %v439_v18  ;;  %v442_v18 = vand.u32 2147483647, %v434_v8 }
  0xcc   : > { %976 = vrot.lane.b32.xlu0 %v1701_v5, %s1631_s5 }
  0xcd   : > { %v463_v14 = vmul.f32 %v455_v1, %v365_v32  ;;  %v465_v1 = vmul.f32 %v457_v43, %v365_v32 }
  0xcf   : > { %v470_v47 = vadd.f32 %v463_v14, %v462_v26 }
  0xd0   : > { %970 = vrot.lane.b32.xlu2 %v1762_v35, %s1631_s5  ;;  %v423_v2 = vpop.permute.xlu0 %422 }
  0xd1   : > { %v471_v22 = vadd.f32 %v470_v47, %v464_v63  ;;  %v450_v52 = vmul.f32 %v423_v2, %v1717_v15  ;;  %v2049_v56 = vpop.permute.xlu1 %689 }
  0xd3   : > { %v458_v11 = vmul.f32 %v450_v52, %v442_v18  ;;  %v472_v9 = vadd.f32 %v471_v22, %v465_v1 }
  0xd4   : > { %1243 = vrot.lane.b32.xlu0 %v1727_v20, %s1632_s6 }
  0xd5   : > { %v466_v14 = vmul.f32 %v458_v11, %v365_v32 }
  0xd7   : > { %v473_v8 = vadd.f32 %v472_v9, %v466_v14 }
  0xd8   : > { %1263 = vrot.lane.b32.xlu2 %v1698_v4, %s1632_s6  ;;  %v429_v26 = vpop.permute.xlu0 %428 }
  0xd9   : > { %v453_v43 = vmul.f32 %v429_v26, %v1770_v40  ;;  %v474_v63 = vadd.f32 %v473_v8, %v467_v38  ;;  %v696_v52 = vpop.permute.xlu1 %695  ;;  %v712_v38 = vsub.f32 %v682_v7, %v1727_v20  ;;  %v629_v8 = vsel %vm628_vm12, 1.0, %v2867_v49 }
  0xda   : > { %v727_v10 = vmul.f32 %v696_v52, %v1909_v39  ;;  %vm776_vm12 = vcmp.lt.s32.totalorder %v1782_v45, 6 }
  0xdb   : > { %v2047_v61 = vpop.xlane.xlu2 %567  ;;  %v461_v47 = vmul.f32 %v453_v43, %v445_v29  ;;  %v475_v2 = vadd.f32 %v474_v63, %v468_v51  ;;  %v720_v29 = vand.u32 2147483647, %v712_v38  ;;  %v2079_v43 = vmul.f32 %v629_v8, %v1919_v46 }
  0xdc   : > { %1245 = vrot.lane.b32.xlu0 %v1745_v28, %s1632_s6  ;;  %v890_v51 = vand.u32 3, %v1879_v23 }
  0xdd   : > { %v469_v58 = vmul.f32 %v461_v47, %v365_v32  ;;  %2868 = vst [vmem:[#allocation22_spill] sm:$0xff] %v2079_v43 }
  0xde   : > { %vm891_vm13 = vcmp.eq.s32.totalorder %v890_v51, 0 }
  0xdf   : > { %v476_v13 = vadd.f32 %v475_v2, %v469_v58  ;;  %v2095_v52 = vsel %vm891_vm13, 1.0, %v2867_v49 }
  0xe0   : > { %986 = vrot.lane.b32.xlu2 %v1755_v33, %s1631_s5  ;;  %2869 = vst [vmem:[#allocation23_spill] sm:$0xff] %v2095_v52 }
  0xe1   : > { %477 = vadd.xlane.f32.xlu1 %v476_v13  ;;  %v702_v39 = vpop.permute.xlu1 %701 }
  0xe2   : > { %v730_v14 = vmul.f32 %v702_v39, %v1944_v57 }
  0xe3   : > { %v680_v18 = vpop.permute.xlu2 %679 }
  0xe4   : > { %v711_v22 = vsub.f32 %v680_v18, %v1720_v16  ;;  %968 = vrot.lane.b32.xlu0 %v1730_v21, %s1631_s5  ;;  %v867_v18 = vand.u32 3, %v1876_v19 }
  0xe6   : > { %v719_v1 = vand.u32 2147483647, %v711_v22  ;;  %vm875_vm15 = vcmp.eq.s32.totalorder %v867_v18, 0 }
  0xe8   : > { %709 = vrot.lane.b32.xlu2 %v1770_v40, %s1629_s30  ;;  %v735_v32 = vmul.f32 %v727_v10, %v719_v1  ;;  %v910_v10 = vsel %vm909_vm14, 1.0, %v2867_v49  ;;  %v2099_v1 = vsel %vm875_vm15, 1.0, %v2867_v49 }
  0xe9   : > { %v963_v7 = vpop.permute.xlu1 %962 }
  0xea   : > { %v743_v58 = vmul.f32 %v735_v32, %v2079_v43  ;;  %v993_v13 = vsub.f32 %v963_v7, %v1727_v20 }
  0xeb   : > { %v686_v59 = vpop.permute.xlu2 %685 }
  0xec   : > { %1261 = vrot.lane.b32.xlu0 %v1737_v25, %s1632_s6  ;;  %v714_v11 = vsub.f32 %v686_v59, %v1704_v6  ;;  %v1001_v32 = vand.u32 2147483647, %v993_v13  ;;  %v2103_v59 = vmul.f32 %v2099_v1, %v1711_v12 }
  0xee   : > { %v722_v3 = vand.u32 2147483647, %v714_v11 }
  0xf0   : > { %1253 = vrot.lane.b32.xlu2 %v1750_v31, %s1632_s6  ;;  %v2074_v26 = vmul.f32 %v730_v14, %v722_v3  ;;  %v2108_v3 = vmul.f32 %v910_v10, %v2095_v52 }
  0xf1   : > { %v979_v11 = vpop.permute.xlu1 %978 }
  0xf2   : > { %2870 = vst [vmem:[#allocation24_spill] sm:$0xff] %v2108_v3  ;;  %v1009_v39 = vmul.f32 %v979_v11, %v2103_v59 }
  0xf3   : > { %v2066_v9 = vpop.permute.xlu2 %691  ;;  %s1544_s7 = spop %1543 }
  0xf4   : > { %984 = vrot.lane.b32.xlu0 %v1717_v15, %s1631_s5  ;;  %v1017_v14 = vmul.f32 %v1009_v39, %v1001_v32 }
  0xf6   : > { %v2112_v8 = vmul.f32 %v1017_v14, %v2108_v3 }
  0xf8   : > { %1255 = vrot.lane.b32.xlu2 %v1776_v42, %s1632_s6 }
  0xfa   : > { %966 = vrot.lane.b32.xlu1 %v1704_v6, %s1631_s5 }
  0xfb   : > { %v698_v63 = vpop.permute.xlu2 %697 }
  0xfc   : > { %v728_v57 = vmul.f32 %v698_v63, %v1913_v41  ;;  %707 = vrot.lane.b32.xlu0 %v1742_v27, %s1629_s30  ;;  %v868_v63 = vand.u32 3, %v1882_v24 }
  0xfe   : > { %v736_v47 = vmul.f32 %v728_v57, %v720_v29  ;;  %vm876_vm0 = vcmp.eq.s32.totalorder %v868_v63, 0 }
  0xff   : > { %v2124_v7 = vsel %vm876_vm0, 1.0, %v2867_v49 }
 0x100   : > { %v744_v2 = vmul.f32 %v736_v47, %v2079_v43 }
 0x102   : > { %v751_v22 = vadd.f32 %v744_v2, %v743_v58  ;;  %1257 = vrot.lane.b32.xlu1 %v1701_v5, %s1632_s6  ;;  %v2131_v58 = vmul.f32 %v2124_v7, %v1737_v25 }
 0x103   : > { %v704_v41 = vpop.permute.xlu2 %703  ;;  %v671_v29 = vpop.xlane.xlu0 %670 }
 0x104   : > { %1251 = vrot.lane.b32.xlu0 %v1762_v35, %s1632_s6  ;;  %v731_v39 = vmul.f32 %v704_v41, %v1954_v62 }
 0x10a   : > { %982 = vrot.lane.b32.xlu1 %v1698_v4, %s1631_s5 }
 0x10b   : > { %v965_v38 = vpop.permute.xlu2 %964 }
 0x10c   : > { %974 = vrot.lane.b32.xlu0 %v1776_v42, %s1631_s5  ;;  %v994_v51 = vsub.f32 %v965_v38, %v1745_v28 }
 0x10e   : > { %v1002_v2 = vand.u32 2147483647, %v994_v51 }
 0x112   : > { %705 = vrot.lane.b32.xlu1 %v1755_v33, %s1629_s30 }
 0x113   : > { %v2119_v57 = vpop.permute.xlu2 %1241 }
 0x114   : > { %1267 = vrot.lane.b32.xlu0 %v1755_v33, %s1632_s6 }
 0x116   : > { %v684_v47 = vpop.permute.xlu0 %683 }
 0x11a   : > { %1249 = vrot.lane.b32.xlu1 %v1730_v21, %s1632_s6 }
 0x11b   : > { %v981_v13 = vpop.permute.xlu2 %980 }
 0x11c   : > { %v1010_v18 = vmul.f32 %v981_v13, %v2131_v58  ;;  %1269 = vrot.lane.b32.xlu0 %v1742_v27, %s1632_s6 }
 0x11e   : > { %v1018_v10 = vmul.f32 %v1010_v18, %v1002_v2  ;;  %v688_v11 = vpop.permute.xlu0 %687  ;;  %v713_v2 = vsub.f32 %v684_v47, %v1745_v28 }
 0x11f   : > { %v715_v14 = vsub.f32 %v688_v11, %v1730_v21  ;;  %v2805_v11 = vrot.slane %v1704_v6, 4 }
 0x120   : > { %v2139_v32 = vmul.f32 %v1018_v10, %v2108_v3  ;;  %v721_v18 = vand.u32 2147483647, %v713_v2  ;;  %v672_v2 = vrot.slane %v671_v29, 4 }
 0x121   : > { %v723_v38 = vand.u32 2147483647, %v715_v14 }
 0x122   : > { %972 = vrot.lane.b32.xlu1 %v1750_v31, %s1631_s5  ;;  %v673_v34 = vadd.f32 %v672_v2, %v671_v29  ;;  %v716_v29 = vsub.f32 %v2049_v56, %v1762_v35  ;;  %v2875_v2 = vrot.slane %v1711_v12, 4 }
 0x123   : > { %v739_v63 = vmul.f32 %v731_v39, %v723_v38  ;;  %v2145_v51 = vpop.permute.xlu2 %1259  ;;  %v866_v39 = vand.u32 3, %v1782_v45  ;;  %v1051_v38 = vrot.slane %v1745_v28, 4 }
 0x125   : > { %vm874_vm2 = vcmp.eq.s32.totalorder %v866_v39, 0  ;;  %v747_v53 = vmul.f32 %v739_v63, %v2079_v43  ;;  %v2873_v63 = vrot.slane %v1698_v4, 4 }
 0x126   : > { %v2147_v13 = vpop.permute.xlu0 %693 }
 0x12a   : > { %1265 = vrot.lane.b32.xlu1 %v1717_v15, %s1632_s6 }
 0x12b   : > { %v2152_v10 = vpop.permute.xlu2 %1247 }
 0x12e   : > { %v700_v62 = vpop.permute.xlu0 %699 }
 0x12f   : > { %v729_v41 = vmul.f32 %v700_v62, %v1927_v50  ;;  %v1062_v50 = vsel %vm1057_vm1, %v1051_v38, %v2805_v11  ;;  %v746_v62 = vmul.f32 %v2074_v26, %v2079_v43  ;;  %v1063_v11 = vsel %vm1057_vm1, %v2871_v44, %v1051_v38 }
 0x130   : > { %v903_v26 = vmul.f32 %v2095_v52, %v1737_v25  ;;  %v2190_v44 = vsel %vm874_vm2, 1.0, %v2867_v49  ;;  %v902_v38 = vmul.f32 %v2095_v52, %v1711_v12  ;;  %v1083_v55 = vsub.f32 %v1063_v11, %v1727_v20 }
 0x131   : > { %v737_v14 = vmul.f32 %v729_v41, %v721_v18  ;;  %v1171_v41 = vand.u32 7, %v1879_v23  ;;  %v569_v18 = vrot.slane %v2047_v61, 4  ;;  %2874 = vst [vmem:[#allocation26_spill] sm:$0xff] %v2190_v44 }
 0x132   : > { %988 = vrot.lane.b32.xlu1 %v1742_v27, %s1631_s5  ;;  %v1091_v46 = vand.u32 2147483647, %v1083_v55 }
 0x133   : > { %v745_v47 = vmul.f32 %v737_v14, %v2079_v43  ;;  %v1078_v14 = vsel %vm1057_vm1, %v1068_v60, %v2873_v63  ;;  %vm1172_vm3 = vcmp.eq.s32.totalorder %v1171_v41, 0  ;;  %v674_v41 = vrot.slane %v673_v34, 2 }
 0x134   : > { %v1100_v11 = vmul.f32 %v1078_v14, %v903_v26  ;;  %v2212_v56 = vsel %vm1172_vm3, 1.0, %v2867_v49  ;;  %v1164_v26 = vsel %vm1156_vm4, 1.0, %v2867_v49 }
 0x135   : > { %v752_v54 = vadd.f32 %v751_v22, %v745_v47  ;;  %v1084_v22 = vsub.f32 %v1062_v50, %v1745_v28  ;;  %v2182_v47 = vpop.permute.xlu2 %970  ;;  %v1079_v50 = vsel %vm1057_vm1, %v2875_v2, %v1068_v60  ;;  %2877 = vst [vmem:[#allocation28_spill] sm:$0xff] %v2212_v56  ;;  %v1331_v60 = vsub.f32 %v1745_v28, %v1727_v20 }
 0x136   : > { %v961_v36 = vpop.permute.xlu0 %960  ;;  %2872 = vst [vmem:[#allocation25_spill] sm:$0xff] %v2182_v47  ;;  %v1099_v2 = vmul.f32 %v1079_v50, %v902_v38  ;;  %v1175_v47 = vmul.f32 %v1164_v26, %v1711_v12  ;;  %v1185_v30 = vmul.f32 %v2212_v56, %v1698_v4 }
 0x137   : > { %v753_v39 = vadd.f32 %v752_v54, %v746_v62  ;;  %v992_v54 = vsub.f32 %v961_v36, %v1720_v16  ;;  %v570_v62 = vadd.f32 %v569_v18, %v2047_v61  ;;  %v1092_v63 = vand.u32 2147483647, %v1084_v22 }
 0x138   : > { %v2209_v36 = vmul.f32 %v2190_v44, %v1701_v5  ;;  %v717_v18 = vsub.f32 %v2066_v9, %v1750_v31  ;;  %v1339_v38 = vand.u32 2147483647, %v1331_v60  ;;  %v1107_v55 = vmul.f32 %v1099_v2, %v1091_v46 }
 0x139   : > { %v2204_v19 = vadd.f32 %v753_v39, %v747_v53  ;;  %v1183_v53 = vmul.f32 %v2212_v56, %v1711_v12  ;;  %v1000_v61 = vand.u32 2147483647, %v992_v54  ;;  %v571_v39 = vrot.slane %v570_v62, 2 }
 0x13a   : > { %990 = vrot.lane.b32.xlu1 %v1770_v40, %s1631_s5  ;;  %v1108_v43 = vmul.f32 %v1100_v11, %v1092_v63  ;;  %v675_v44 = vadd.f32 %v674_v41, %v673_v34  ;;  %v2228_v9 = vand.u32 2147483647, %v717_v18  ;;  %v2239_v46 = vmul.f32 %v2131_v58, %v2095_v52 }
 0x13b   : > { %2876 = vst [vmem:[#allocation27_spill] sm:$0xff] %v2204_v19  ;;  %v2223_v19 = vand.u32 2147483647, %v716_v29  ;;  %v1347_v50 = vmul.f32 %v1183_v53, %v1737_v25  ;;  %v1333_v29 = vsub.f32 %v1730_v21, %v1704_v6  ;;  %v937_v34 = vmul.f32 %v2103_v59, %v2095_v52 }
 0x13c   : > { %2879 = vst [vmem:[#allocation30_spill] sm:$0xff] %v2228_v9  ;;  %v2245_v11 = vmul.f32 %v1108_v43, %v2124_v7  ;;  %v2248_v41 = vmul.f32 %v1175_v47, %v2212_v56  ;;  %v2821_v60 = vrot.slane %v1720_v16, 4  ;;  %v572_v2 = vadd.f32 %v571_v39, %v570_v62  ;;  %v2888_v9 = vld [vmem:[#allocation21_spill] sm:$0xff] }
 0x13d   : > { %2878 = vst [vmem:[#allocation29_spill] sm:$0xff] %v2223_v19  ;;  %v2226_v17 = vpop.permute.xlu2 %1263  ;;  %v1355_v58 = vmul.f32 %v1347_v50, %v1339_v38  ;;  %v1166_v59 = vsel %vm1158_vm5, 1.0, %v2867_v49  ;;  %v1341_v18 = vand.u32 2147483647, %v1333_v29  ;;  %v1349_v43 = vmul.f32 %v1185_v30, %v1717_v15 }
 0x13e   : > { %v977_v14 = vpop.permute.xlu0 %976  ;;  %v2822_v39 = vrot.slane %v1750_v31, 4  ;;  %v1191_v38 = vsel %vm1190_vm6, 1.0, %v2867_v49  ;;  %v1177_v50 = vmul.f32 %v1166_v59, %v1698_v4  ;;  %v1054_v29 = vrot.slane %v1762_v35, 4 }
 0x13f   : > { %v1008_v22 = vmul.f32 %v977_v14, %v2209_v36  ;;  %v1290_v14 = vmul.f32 %v2145_v51, %v1175_v47  ;;  %v573_v51 = vrot.slane %v572_v2, 1  ;;  %v2273_v47 = vmul.f32 %v1355_v58, %v1164_v26 }
 0x140   : > { %v1292_v23 = vmul.f32 %v2226_v17, %v1177_v50 }
 0x141   : > { %v1016_v54 = vmul.f32 %v1008_v22, %v1000_v61  ;;  %v676_v61 = vrot.slane %v675_v44, 1  ;;  %v2881_v22 = vrot.slane %v1727_v20, 4  ;;  %2882 = vst [vmem:[#allocation32_spill] sm:$0xff] %v2273_v47 }
 0x142   : > { %1271 = vrot.lane.b32.xlu1 %v1770_v40, %s1632_s6  ;;  %v2252_v40 = vmul.f32 %v1107_v55, %v2099_v1 }
 0x143   : > { %v1024_v63 = vmul.f32 %v1016_v54, %v2108_v3  ;;  %v1064_v30 = vsel %vm1057_vm1, %v2821_v60, %v2881_v22  ;;  %v901_v54 = vmul.f32 %v2095_v52, %v1701_v5  ;;  %v2307_v22 = vmul.f32 %v1177_v50, %v2212_v56  ;;  %v2343_v60 = vld [vmem:[%s1692_s28 + $0x20] sm:$0xff] }
 0x144   : > { %v1082_v58 = vsub.f32 %v1064_v30, %v1720_v16  ;;  %v2887_v50 = vld [vmem:[#allocation26_spill] sm:$0xff] }
 0x145   : > { %v1032_v53 = vadd.f32 %v2112_v8, %v1024_v63  ;;  %v1273_v8 = vsub.f32 %v2119_v57, %v1720_v16  ;;  %v1357_v57 = vmul.f32 %v1349_v43, %v1341_v18  ;;  %v2883_v63 = vrot.slane %v1711_v12, 4  ;;  %2884 = vst [vmem:[#allocation33_spill] sm:$0xff] %v2307_v22 }
 0x146   : > { %v1244_v7 = vpop.permute.xlu0 %1243  ;;  %v1059_v12 = vsel %vm1057_vm1, %v1054_v29, %v2822_v39  ;;  %v2820_v43 = vrot.slane %v1742_v27, 4 }
 0x147   : > { %v1274_v62 = vsub.f32 %v1244_v7, %v1727_v20  ;;  %v2262_v1 = vadd.f32 %v1032_v53, %v2139_v32  ;;  %v2276_v32 = vadd.f32 %v676_v61, %v675_v44  ;;  %v1080_v26 = vsel %vm1057_vm1, %v2819_v0, %v2883_v63  ;;  %v2290_v53 = vpop.permute.xlu2 %986 }
 0x148   : > { %v871_v44 = vand.u32 3, %v1922_v48  ;;  %v2294_v18 = vand.u32 2147483647, %v1273_v8  ;;  %v2301_v7 = vadd.f32 %v573_v51, %v572_v2  ;;  %v2823_v8 = vrot.slane %v1730_v21, 4 }
 0x149   : > { %2880 = vst [vmem:[#allocation31_spill] sm:$0xff] %v2262_v1  ;;  %v1282_v55 = vand.u32 2147483647, %v1274_v62  ;;  %v2304_v62 = vmul.f32 %v1191_v38, %v2212_v56  ;;  %v2312_v30 = vmul.f32 %v1357_v57, %v1166_v59  ;;  %v906_v63 = vmul.f32 %v2095_v52, %v1755_v33 }
 0x14a   : > { %v1071_v2 = vrot.slane %v1755_v33, 4  ;;  %v1090_v51 = vand.u32 2147483647, %v1082_v58  ;;  %vm879_vm7 = vcmp.eq.s32.totalorder %v871_v44, 0  ;;  %v1087_v38 = vsub.f32 %v1059_v12, %v1762_v35 }
 0x14b   : > { %v2292_v61 = vmul.f32 %v1290_v14, %v1282_v55  ;;  %v936_v14 = vmul.f32 %v2209_v36, %v2095_v52  ;;  %2885 = vst [vmem:[#allocation34_spill] sm:$0xff] %v2312_v30  ;;  %v1098_v55 = vmul.f32 %v1080_v26, %v901_v54  ;;  %v1060_v36 = vsel %vm1057_vm1, %v2823_v8, %v1054_v29  ;;  %v2354_v30 = vld [vmem:[%s1692_s28 + $0x18] sm:$0xff] }
 0x14c   : > { %v1276_v59 = vsub.f32 %v2152_v10, %v1704_v6  ;;  %v1075_v57 = vsel %vm1057_vm1, %v1071_v2, %v2820_v43  ;;  %v1184_v54 = vmul.f32 %v2212_v56, %v1737_v25  ;;  %v1332_v26 = vsub.f32 %v1704_v6, %v1745_v28 }
 0x14d   : > { %v718_v58 = vsub.f32 %v2147_v13, %v1776_v42  ;;  %v2336_v44 = vadd.f32 %v937_v34, %v936_v14  ;;  %v1149_v29 = vand.u32 7, %v1882_v24  ;;  %v2828_v10 = vrot.slane %v1717_v15, 4 }
 0x14e   : > { %v2318_v0 = vpop.permute.xlu0 %1245  ;;  %v887_v12 = vsel %vm879_vm7, 1.0, %v2867_v49  ;;  %v870_v43 = vand.u32 3, %v1902_v37  ;;  %v905_v25 = vmul.f32 %v2343_v60, %v2095_v52  ;;  %v1086_v39 = vsub.f32 %v1060_v36, %v1730_v21 }
 0x14f   : > { %v1106_v8 = vmul.f32 %v1098_v55, %v1090_v51  ;;  %v1095_v13 = vand.u32 2147483647, %v1087_v38  ;;  %v1103_v34 = vmul.f32 %v1075_v57, %v906_v63  ;;  %v1076_v24 = vsel %vm1057_vm1, %v2828_v10, %v1071_v2  ;;  %v710_v36 = vpop.permute.xlu2 %709  ;;  %v2886_v51 = vld [vmem:[#allocation25_spill] sm:$0xff] }
 0x150   : > { %v1284_v14 = vand.u32 2147483647, %v1276_v59  ;;  %v1340_v27 = vand.u32 2147483647, %v1332_v26  ;;  %v1348_v22 = vmul.f32 %v2354_v30, %v1184_v54  ;;  %v898_v19 = vmul.f32 %v887_v12, %v1755_v33 }
 0x151   : > { %vm1157_vm8 = vcmp.eq.s32.totalorder %v1149_v29, 0  ;;  %v1147_v63 = vand.u32 7, %v1782_v45  ;;  %v997_v38 = vsub.f32 %v2886_v51, %v1762_v35  ;;  %vm878_vm9 = vcmp.eq.s32.totalorder %v870_v43, 0  ;;  %v2889_v43 = vld [vmem:[#allocation7_spill] sm:$0xff] }
 0x152   : > { %v1094_v2 = vand.u32 2147483647, %v1086_v39  ;;  %v1102_v59 = vmul.f32 %v1076_v24, %v905_v25  ;;  %v726_v17 = vand.u32 2147483647, %v718_v58  ;;  %v1114_v57 = vmul.f32 %v1106_v8, %v2887_v50 }
 0x153   : > { %v1111_v26 = vmul.f32 %v1103_v34, %v1095_v13  ;;  %v1300_v54 = vmul.f32 %v1292_v23, %v1284_v14  ;;  %v734_v33 = vmul.f32 %v710_v36, %v2888_v9  ;;  %v1165_v47 = vsel %vm1157_vm8, 1.0, %v2867_v49  ;;  %v2373_v9 = vld [vmem:[%s1692_s28 + $0x10] sm:$0xff] }
 0x154   : > { %v478_v5 = vpop.xlane.xlu1 %477  ;;  %v1356_v29 = vmul.f32 %v1348_v22, %v1340_v27  ;;  %v886_v37 = vsel %vm878_vm9, 1.0, %v2867_v49  ;;  %vm1155_vm10 = vcmp.eq.s32.totalorder %v1147_v63, 0  ;;  %v869_v39 = vand.u32 3, %v2889_v43 }
 0x155   : > { %v479_v55 = vrot.slane %v478_v5, 4  ;;  %v1005_v25 = vand.u32 2147483647, %v997_v38  ;;  %v2367_v58 = vmul.f32 %v898_v19, %v2095_v52  ;;  %v1013_v8 = vmul.f32 %v2290_v53, %v898_v19  ;;  %v2409_v38 = vld [vmem:[%s1692_s28] sm:$0xff] }
 0x156   : > { %v969_v3 = vpop.permute.xlu0 %968  ;;  %v2370_v23 = vmul.f32 %v1111_v26, %v887_v12  ;;  %v1176_v27 = vmul.f32 %v2373_v9, %v1165_v47  ;;  %vm877_vm11 = vcmp.eq.s32.totalorder %v869_v39, 0  ;;  %v2377_v13 = vadd.f32 %v2252_v40, %v1114_v57  ;;  %2897 = vst [vmem:[#allocation38_spill] sm:$0xff] %v2409_v38 }
 0x157   : > { %v480_v10 = vadd.f32 %v479_v55, %v478_v5  ;;  %v1110_v5 = vmul.f32 %v1102_v59, %v1094_v2  ;;  %v742_v34 = vmul.f32 %v734_v33, %v726_v17  ;;  %v2380_v24 = vmul.f32 %v2343_v60, %v886_v37 }
 0x158   : > { %2890 = vst [vmem:[#allocation25_spill] sm:$0xff] %v2370_v23  ;;  %v2383_v14 = vsel %vm1155_vm10, 1.0, %v2867_v49  ;;  %v2386_v19 = vmul.f32 %v1300_v54, %v2304_v62  ;;  %v2389_v53 = vmul.f32 %v1176_v27, %v2212_v56  ;;  %v2391_v12 = vmul.f32 %v1356_v29, %v1165_v47 }
 0x159   : > { %v481_v1 = vrot.slane %v480_v10, 2  ;;  %2891 = vst [vmem:[#allocation26_spill] sm:$0xff] %v2380_v24  ;;  %v940_v40 = vmul.f32 %v2380_v24, %v2095_v52  ;;  %v2397_v36 = vmul.f32 %v1110_v5, %v886_v37  ;;  %v2400_v55 = vsel %vm877_vm11, 1.0, %v2867_v49 }
 0x15a   : > { %2892 = vst [vmem:[#allocation21_spill] sm:$0xff] %v2386_v19  ;;  %v2404_v63 = vmul.f32 %v2292_v61, %v2304_v62  ;;  %v1275_v51 = vsub.f32 %v2318_v0, %v1745_v28  ;;  %v2413_v2 = vmul.f32 %v2409_v38, %v2383_v14  ;;  %v996_v37 = vsub.f32 %v969_v3, %v1730_v21  ;;  %v2898_v61 = vld [vmem:[#allocation22_spill] sm:$0xff] }
 0x15b   : > { %v482_v22 = vadd.f32 %v481_v1, %v480_v10  ;;  %2893 = vst [vmem:[#allocation7_spill] sm:$0xff] %v2391_v12  ;;  %v2393_v10 = vmul.f32 %v1013_v8, %v1005_v25  ;;  %v1182_v59 = vmul.f32 %v2409_v38, %v2212_v56  ;;  %v1330_v17 = vsub.f32 %v1727_v20, %v1720_v16  ;;  %v2530_v12 = vld [vmem:[%s1692_s28 + $0x28] sm:$0xff] }
 0x15c   : > { %2895 = vst [vmem:[#allocation36_spill] sm:$0xff] %v2397_v36  ;;  %v2421_v50 = vmul.f32 %v742_v34, %v2898_v61  ;;  %v1217_v0 = vmul.f32 %v2413_v2, %v2212_v56  ;;  %v2427_v57 = vmul.f32 %v2354_v30, %v2400_v55  ;;  %v769_v3 = vrot.slane %v1727_v20, 2 }
 0x15d   : > { %v483_v1 = vrot.slane %v482_v22, 1  ;;  %2894 = vst [vmem:[#allocation35_spill] sm:$0xff] %v2393_v10  ;;  %v770_v26 = vrot.slane %v1745_v28, 2  ;;  %v904_v54 = vmul.f32 %v2354_v30, %v2095_v52  ;;  %v2900_v33 = vrot.slane %v1730_v21, 4 }
 0x15e   : > { %2896 = vst [vmem:[#allocation37_spill] sm:$0xff] %v2400_v55  ;;  %v2901_v29 = vrot.slane %v1704_v6, 4  ;;  %v1283_v25 = vand.u32 2147483647, %v1275_v51  ;;  %v1262_v8 = vpop.permute.xlu0 %1261  ;;  %v945_v5 = vadd.f32 %v2336_v44, %v2239_v46  ;;  %v2903_v34 = vrot.slane %v1698_v4, 4  ;;  %v2456_v51 = vld [vmem:[%s1692_s28 + $0x8] sm:$0xff] }
 0x15f   : > { %v484_v47 = vadd.f32 %v483_v1, %v482_v22  ;;  %2899 = vst [vmem:[#allocation39_spill] sm:$0xff] %v2421_v50  ;;  %v2902_v22 = vrot.slane %v1717_v15, 4  ;;  %v2460_v39 = vadd.f32 %v2248_v41, %v1217_v0  ;;  %v771_v15 = vrot.slane %v1704_v6, 2 }
 0x160   : > { %v1061_v43 = vsel %vm1057_vm1, %v2901_v29, %v2900_v33  ;;  %v1291_v33 = vmul.f32 %v1262_v8, %v1176_v27  ;;  %v1338_v29 = vand.u32 2147483647, %v1330_v17  ;;  %v2466_v4 = vsel %vm776_vm12, %v769_v3, %v770_v26 }
 0x161   : > { %1545 = vpush %v484_v47  ;;  %v1077_v1 = vsel %vm1057_vm1, %v2903_v34, %v2902_v22  ;;  %v2453_v47 = vand.u32 2147483647, %v996_v37  ;;  %v1085_v46 = vsub.f32 %v1061_v43, %v1704_v6  ;;  %v2906_v37 = vld [vmem:[#allocation12_spill] sm:$0xff]  ;;  %v2907_v17 = vrot.slane %v1720_v16, 2  ;;  %v2908_v43 = vld [vmem:[#allocation14_spill] sm:$0xff] }
 0x162   : > { %1547 = vpush %v2301_v7  ;;  %v939_v7 = vmul.f32 %v2427_v57, %v2095_v52  ;;  %v2468_v44 = vmul.f32 %v1077_v1, %v904_v54  ;;  %v2472_v27 = vmul.f32 %v2409_v38, %v2906_v37  ;;  %v872_v8 = vand.u32 3, %v2908_v43  ;;  %v2538_v43 = vld [vmem:[%s1692_s28 + $0x38] sm:$0xff] }
 0x163   : > { %1549 = vpush %v2276_v32  ;;  %v1346_v32 = vmul.f32 %v2456_v51, %v1182_v59  ;;  %v774_v59 = vrot.slane %v1750_v31, 2  ;;  %v2479_v41 = vsel %vm776_vm12, %v2907_v17, %v769_v3  ;;  %v2484_v54 = vmul.f32 %v2456_v51, %v2906_v37 }
 0x164   : > { %2904 = vst [vmem:[#allocation40_spill] sm:$0xff] %v2453_v47  ;;  %v946_v0 = vadd.f32 %v945_v5, %v939_v7  ;;  %v773_v22 = vrot.slane %v1762_v35, 2  ;;  %v2487_v34 = vmul.f32 %v1291_v33, %v1283_v25  ;;  %v2493_v10 = vmul.f32 %v2373_v9, %v2906_v37  ;;  %v2909_v5 = vld [vmem:[#allocation5_spill] sm:$0xff] }
 0x165   : > { %2905 = vst [vmem:[#allocation41_spill] sm:$0xff] %v2468_v44  ;;  %v2489_v1 = vmul.f32 %v1346_v32, %v1338_v29  ;;  %v772_v3 = vrot.slane %v1730_v21, 2  ;;  %v2496_v7 = vand.u32 2147483647, %v1085_v46  ;;  %v873_v17 = vand.u32 3, %v2909_v5  ;;  %v2516_v46 = vld [vmem:[%s1692_s28 + $0x30] sm:$0xff]  ;;  %s306_s28 = scalar_lea.vmem %s2793_s3, %s2970_s15 }
 0x166   : > { %vm880_vm13 = vcmp.eq.s32.totalorder %v872_v8, 0  ;;  %v2501_v23 = vmul.f32 %v2354_v30, %v2906_v37  ;;  %v2508_v33 = vmul.f32 %v2343_v60, %v2906_v37  ;;  %v775_v32 = vrot.slane %v1776_v42, 2  ;;  %2913 = vst [vmem:[#allocation43_spill] sm:$0xff] %v2538_v43 }
 0x167   : > { %v2504_v25 = vsel %vm880_vm13, 1.0, %v2867_v49  ;;  %v2513_v29 = vsel %vm776_vm12, %v773_v22, %v774_v59  ;;  %vm881_vm14 = vcmp.eq.s32.totalorder %v873_v17, 0  ;;  %v947_v47 = vadd.f32 %v946_v0, %v940_v40 }
 0x168   : > { %2910 = vst [vmem:[#allocation12_spill] sm:$0xff] %v2504_v25  ;;  %v2520_v8 = vmul.f32 %v2516_v46, %v2504_v25  ;;  %v779_v36 = vsel %vm776_vm12, %v772_v3, %v773_v22  ;;  %v2527_v61 = vsel %vm881_vm14, 1.0, %v2867_v49  ;;  %v625_v17 = vmul.f32 %v2530_v12, %v2906_v37 }
 0x169   : > { %2912 = vst [vmem:[#allocation42_spill] sm:$0xff] %v2527_v61  ;;  %v780_v24 = vsel %vm776_vm12, %v771_v15, %v772_v3  ;;  %v785_v25 = vrot.slane %v2409_v38, 2  ;;  %v2542_v40 = vmul.f32 %v2538_v43, %v2527_v61  ;;  %v948_v22 = vadd.f32 %v947_v47, %v2367_v58 }
 0x16a   : > { %2911 = vst [vmem:[#allocation5_spill] sm:$0xff] %v2520_v8  ;;  %v942_v0 = vmul.f32 %v2520_v8, %v2095_v52  ;;  %v786_v19 = vrot.slane %v2456_v51, 2  ;;  %v777_v55 = vsel %vm776_vm12, %v774_v59, %v775_v32  ;;  %v781_v3 = vsel %vm776_vm12, %v770_v26, %v771_v15 }
 0x16b   : > { %2914 = vst [vmem:[#allocation44_spill] sm:$0xff] %v2542_v40  ;;  %v787_v38 = vrot.slane %v2373_v9, 2  ;;  %v791_v56 = vrot.slane %v2516_v46, 2  ;;  %v943_v61 = vmul.f32 %v2542_v40, %v2095_v52  ;;  %v788_v8 = vrot.slane %v2354_v30, 2 }
 0x16c   : > { %v2524_v50 = vpop.permute.xlu1 %966  ;;  %v949_v44 = vadd.f32 %v948_v22, %v942_v0  ;;  %v790_v58 = vrot.slane %v2530_v12, 2  ;;  %v626_v47 = vmul.f32 %v2516_v46, %v2906_v37  ;;  %v627_v51 = vmul.f32 %v2538_v43, %v2906_v37 }
 0x16d   : > { %v2915_v26 = vrot.slane %v1720_v16, 2  ;;  %v789_v15 = vrot.slane %v2343_v60, 2  ;;  %vm637_vm15 = vcmp.lt.s32.totalorder %v2909_v5, 62  ;;  %v792_v30 = vrot.slane %v2538_v43, 2  ;;  %v2587_v43 = vpop.permute.xlu0 %984 }
 0x16e   : > { %v950_v59 = vadd.f32 %v949_v44, %v943_v61  ;;  %v799_v0 = vsel %vm776_vm12, %v785_v25, %v786_v19  ;;  %v801_v22 = vsub.f32 %v2479_v41, %v1720_v16  ;;  %v794_v37 = vsel %vm776_vm12, %v790_v58, %v791_v56  ;;  %2916 = vst [vmem:[#allocation45_spill] sm:$0xff] %v2587_v43 }
 0x16f   : > { %v784_v9 = vsel %vm776_vm12, %v775_v32, %v2915_v26  ;;  %v802_v40 = vsub.f32 %v2466_v4, %v1727_v20  ;;  %v803_v32 = vsub.f32 %v781_v3, %v1745_v28  ;;  %v804_v61 = vsub.f32 %v780_v24, %v1704_v6 }
 0x170   : > { %v995_v44 = vsub.f32 %v2524_v50, %v1704_v6  ;;  %951 = vadd.xlane.f32.xlu1 %v950_v59  ;;  %v795_v26 = vsel %vm776_vm12, %v789_v15, %v790_v58  ;;  %v797_v41 = vsel %vm776_vm12, %v787_v38, %v788_v8  ;;  %v798_v16 = vsel %vm776_vm12, %v786_v19, %v787_v38  ;;  %v2957_v45 = vld [vmem:[#allocation42_spill] sm:$0xff] }
 0x171   : > { %v796_v28 = vsel %vm776_vm12, %v788_v8, %v789_v15  ;;  %v805_v24 = vsub.f32 %v779_v36, %v1730_v21  ;;  %v809_v4 = vand.u32 2147483647, %v801_v22  ;;  %v817_v6 = vmul.f32 %v799_v0, %v2472_v27 }
 0x172   : > { %v806_v3 = vsub.f32 %v2513_v29, %v1762_v35  ;;  %v810_v58 = vand.u32 2147483647, %v802_v40  ;;  %v811_v59 = vand.u32 2147483647, %v803_v32  ;;  %v807_v19 = vsub.f32 %v777_v55, %v1750_v31 }
 0x173   : > { %v812_v38 = vand.u32 2147483647, %v804_v61  ;;  %v818_v52 = vmul.f32 %v798_v16, %v2484_v54  ;;  %v819_v43 = vmul.f32 %v797_v41, %v2493_v10  ;;  %v793_v36 = vsel %vm776_vm12, %v791_v56, %v792_v30  ;;  %v2918_v61 = vld [vmem:[#allocation9_spill] sm:$0xff] }
 0x174   : > { %v1258_v20 = vpop.permute.xlu1 %1257  ;;  %v820_v27 = vmul.f32 %v796_v28, %v2501_v23  ;;  %v808_v29 = vsub.f32 %v784_v9, %v1776_v42  ;;  %v813_v40 = vand.u32 2147483647, %v805_v24  ;;  %v821_v55 = vmul.f32 %v795_v26, %v2508_v33 }
 0x175   : > { %v1289_v50 = vmul.f32 %v1258_v20, %v2413_v2  ;;  %v800_v2 = vsel %vm776_vm12, %v792_v30, %v785_v25  ;;  %v825_v15 = vmul.f32 %v817_v6, %v809_v4  ;;  %v814_v54 = vand.u32 2147483647, %v806_v3  ;;  %v2917_v30 = vld [vmem:[#allocation8_spill] sm:$0xff]  ;;  %v2919_v20 = vld [vmem:[#allocation11_spill] sm:$0xff]  ;;  %v708_v24 = vpop.permute.xlu0 %707  ;;  %v2920_v6 = vld [vmem:[#allocation13_spill] sm:$0xff] }
 0x176   : > { %v826_v10 = vmul.f32 %v818_v52, %v810_v58  ;;  %v827_v0 = vmul.f32 %v819_v43, %v811_v59  ;;  %v822_v22 = vmul.f32 %v794_v37, %v625_v17  ;;  %v823_v32 = vmul.f32 %v793_v36, %v626_v47  ;;  %v2922_v36 = vld [vmem:[#allocation10_spill] sm:$0xff] }
 0x177   : > { %v1297_v8 = vmul.f32 %v1289_v50, %v2294_v18  ;;  %v815_v18 = vand.u32 2147483647, %v807_v19  ;;  %v828_v56 = vmul.f32 %v820_v27, %v812_v38  ;;  %v1307_v25 = vmul.f32 %v2487_v34, %v2304_v62  ;;  %v2921_v38 = vld [vmem:[#allocation15_spill] sm:$0xff] }
 0x178   : > { %v833_v9 = vmul.f32 %v825_v15, %v2917_v30  ;;  %v834_v41 = vmul.f32 %v826_v10, %v2918_v61  ;;  %v1003_v33 = vand.u32 2147483647, %v995_v44  ;;  %v645_v52 = vsel %vm637_vm15, 1.0, %v2867_v49  ;;  %v2923_v27 = vld [vmem:[#allocation19_spill] sm:$0xff]  ;;  %v2926_v15 = vld [vmem:[#allocation20_spill] sm:$0xff]  ;;  %v2932_v61 = vld [vmem:[#allocation37_spill] sm:$0xff] }
 0x179   : > { %v1305_v16 = vmul.f32 %v1297_v8, %v2304_v62  ;;  %v829_v43 = vmul.f32 %v821_v55, %v813_v40  ;;  %v835_v17 = vmul.f32 %v827_v0, %v2919_v20  ;;  %v816_v28 = vand.u32 2147483647, %v808_v29  ;;  %v2924_v40 = vld [vmem:[#allocation41_spill] sm:$0xff]  ;;  %v2929_v0 = vld [vmem:[#allocation31_spill] sm:$0xff]  ;;  %v2931_v30 = vld [vmem:[#allocation32_spill] sm:$0xff] }
 0x17a   : > { %v824_v34 = vmul.f32 %v800_v2, %v627_v51  ;;  %v831_v4 = vmul.f32 %v823_v32, %v815_v18  ;;  %v836_v50 = vmul.f32 %v828_v56, %v2920_v6  ;;  %v841_v3 = vadd.f32 %v834_v41, %v833_v9  ;;  %v2935_v20 = vld [vmem:[#allocation30_spill] sm:$0xff] }
 0x17b   : > { %v1313_v23 = vadd.f32 %v2404_v63, %v1305_v16  ;;  %v830_v63 = vmul.f32 %v822_v22, %v814_v54  ;;  %v1226_v44 = vadd.f32 %v2460_v39, %v2389_v53  ;;  %v1362_v58 = vmul.f32 %v2489_v1, %v2383_v14  ;;  %v2925_v53 = vld [vmem:[#allocation24_spill] sm:$0xff] }
 0x17c   : > { %v983_v26 = vpop.permute.xlu1 %982  ;;  %v1123_v19 = vadd.f32 %v2377_v13, %v2245_v11  ;;  %v842_v8 = vadd.f32 %v841_v3, %v835_v17  ;;  %v1152_v51 = vand.u32 7, %v1922_v48  ;;  %v1151_v2 = vand.u32 7, %v2922_v36  ;;  %v2927_v16 = vld [vmem:[#allocation16_spill] sm:$0xff]  ;;  %v2928_v11 = vld [vmem:[#allocation18_spill] sm:$0xff]  ;;  %v2940_v36 = vld [vmem:[#allocation7_spill] sm:$0xff] }
 0x17d   : > { %v1314_v47 = vadd.f32 %v1313_v23, %v1307_v25  ;;  %v1011_v37 = vmul.f32 %v983_v26, %v2427_v57  ;;  %v837_v57 = vmul.f32 %v829_v43, %v2921_v38  ;;  %v733_v29 = vmul.f32 %v708_v24, %v2923_v27  ;;  %v2930_v48 = vld [vmem:[#allocation28_spill] sm:$0xff]  ;;  %v2936_v24 = vld [vmem:[#allocation29_spill] sm:$0xff]  ;;  %v2937_v38 = vld [vmem:[#allocation14_spill] sm:$0xff] }
 0x17e   : > { %v1109_v55 = vmul.f32 %v2924_v40, %v2496_v7  ;;  %v654_v14 = vmul.f32 %v645_v52, %v2926_v15  ;;  %v832_v1 = vmul.f32 %v824_v34, %v816_v28  ;;  %v838_v54 = vmul.f32 %v830_v63, %v2927_v16  ;;  %v2934_v52 = vld [vmem:[#allocation21_spill] sm:$0xff]  ;;  %v2941_v27 = vld [vmem:[#allocation22_spill] sm:$0xff] }
 0x17f   : > { %v1019_v59 = vmul.f32 %v1011_v37, %v1003_v33  ;;  %v839_v13 = vmul.f32 %v831_v4, %v2928_v11  ;;  %v843_v10 = vadd.f32 %v842_v8, %v836_v50  ;;  %v1187_v22 = vmul.f32 %v2530_v12, %v2930_v48  ;;  %v2933_v33 = vld [vmem:[#allocation17_spill] sm:$0xff] }
 0x180   : > { %vm1159_vm0 = vcmp.eq.s32.totalorder %v1151_v2, 0  ;;  %v1186_v7 = vmul.f32 %v2343_v60, %v2930_v48  ;;  %vm1160_vm2 = vcmp.eq.s32.totalorder %v1152_v51, 0  ;;  %v1335_v25 = vsub.f32 %v1750_v31, %v1762_v35  ;;  %v2939_v8 = vld [vmem:[#allocation45_spill] sm:$0xff] }
 0x181   : > { %v1027_v39 = vmul.f32 %v1019_v59, %v2925_v53  ;;  %v844_v56 = vadd.f32 %v843_v10, %v837_v57  ;;  %v1334_v23 = vsub.f32 %v1762_v35, %v1730_v21  ;;  %v1370_v9 = vadd.f32 %v2931_v30, %v1362_v58  ;;  %v2938_v57 = vld [vmem:[#allocation26_spill] sm:$0xff]  ;;  %v2943_v11 = vld [vmem:[#allocation33_spill] sm:$0xff]  ;;  %v2946_v30 = vld [vmem:[#allocation43_spill] sm:$0xff] }
 0x182   : > { %v1117_v41 = vmul.f32 %v1109_v55, %v2932_v61  ;;  %v2650_v43 = vadd.f32 %v1314_v47, %v2934_v52  ;;  %v741_v17 = vmul.f32 %v733_v29, %v2935_v20  ;;  %v840_v37 = vmul.f32 %v832_v1, %v654_v14  ;;  %v2942_v1 = vld [vmem:[#allocation27_spill] sm:$0xff] }
 0x183   : > { %v2636_v18 = vadd.f32 %v2929_v0, %v1027_v39  ;;  %v845_v28 = vadd.f32 %v844_v56, %v838_v54  ;;  %v1167_v34 = vsel %vm1159_vm0, 1.0, %v2867_v49  ;;  %v1168_v4 = vsel %vm1160_vm2, 1.0, %v2867_v49  ;;  %v2674_v0 = vpop.permute.xlu0 %1251 }
 0x184   : > { %v706_v32 = vpop.permute.xlu1 %705  ;;  %v1342_v6 = vand.u32 2147483647, %v1334_v23  ;;  %v1350_v50 = vmul.f32 %v2530_v12, %v1186_v7  ;;  %v1343_v58 = vand.u32 2147483647, %v1335_v25  ;;  %v1351_v59 = vmul.f32 %v2516_v46, %v1187_v22  ;;  %v2945_v25 = vld [vmem:[#allocation23_spill] sm:$0xff] }
 0x185   : > { %v732_v26 = vmul.f32 %v706_v32, %v2933_v33  ;;  %v846_v3 = vadd.f32 %v845_v28, %v839_v13  ;;  %v1153_v47 = vand.u32 7, %v2937_v38  ;;  %v1012_v51 = vmul.f32 %v2939_v8, %v2938_v57  ;;  %v2944_v32 = vld [vmem:[#allocation34_spill] sm:$0xff]  ;;  %v2947_v33 = vld [vmem:[#allocation39_spill] sm:$0xff] }
 0x186   : > { %v1371_v2 = vadd.f32 %v1370_v9, %v2940_v36  ;;  %v2664_v40 = vmul.f32 %v2343_v60, %v1167_v34  ;;  %v749_v55 = vmul.f32 %v741_v17, %v2941_v27  ;;  %v1124_v39 = vadd.f32 %v1123_v19, %v1117_v41  ;;  %v2953_v38 = vld [vmem:[#allocation2_spill] sm:$0xff] }
 0x187   : > { %v740_v63 = vmul.f32 %v732_v26, %v2936_v24  ;;  %v847_v15 = vadd.f32 %v846_v3, %v840_v37  ;;  %v2668_v14 = vmul.f32 %v2530_v12, %v1168_v4  ;;  %v1227_v13 = vadd.f32 %v1226_v44, %v2943_v11  ;;  %v2951_v3 = vld [vmem:[#allocation4_spill] sm:$0xff] }
 0x188   : > { %v1221_v54 = vmul.f32 %v2664_v40, %v2930_v48  ;;  %v1358_v10 = vmul.f32 %v1350_v50, %v1342_v6  ;;  %v1359_v19 = vmul.f32 %v1351_v59, %v1343_v58  ;;  %vm1161_vm3 = vcmp.eq.s32.totalorder %v1153_v47, 0 }
 0x189   : > { %v748_v29 = vmul.f32 %v740_v63, %v2941_v27  ;;  %848 = vadd.xlane.f32.xlu0 %v847_v15  ;;  %v1222_v60 = vmul.f32 %v2668_v14, %v2930_v48  ;;  %v1188_v12 = vmul.f32 %v2516_v46, %v2930_v48  ;;  %v1372_v56 = vadd.f32 %v1371_v2, %v2944_v32  ;;  %v2949_v63 = vld [vmem:[#allocation3_spill] sm:$0xff] }
 0x18a   : > { %v1336_v44 = vsub.f32 %v1776_v42, %v1750_v31  ;;  %v907_v23 = vmul.f32 %v2516_v46, %v2945_v25  ;;  %v908_v9 = vmul.f32 %v2946_v30, %v2945_v25  ;;  %vm918_vm4 = vcmp.lt.s32.totalorder %v2909_v5, 60 }
 0x18b   : > { %v755_v16 = vadd.f32 %v2942_v1, %v748_v29  ;;  %v1056_v61 = vrot.slane %v1776_v42, 4  ;;  %v1073_v41 = vrot.slane %v2946_v30, 4  ;;  %v1228_v52 = vadd.f32 %v1227_v13, %v1221_v54  ;;  %v2956_v1 = vld [vmem:[#allocation40_spill] sm:$0xff] }
 0x18c   : > { %v2676_v22 = vpop.permute.xlu1 %1249  ;;  %v1366_v20 = vmul.f32 %v1358_v10, %v1167_v34  ;;  %v1169_v17 = vsel %vm1161_vm3, 1.0, %v2867_v49  ;;  %v1352_v37 = vmul.f32 %v2946_v30, %v1188_v12  ;;  %v2948_v28 = vrot.slane %v1750_v31, 4 }
 0x18d   : > { %v756_v7 = vadd.f32 %v755_v16, %v749_v55  ;;  %v2950_v6 = vrot.slane %v2949_v63, 4  ;;  %v2952_v58 = vrot.slane %v2951_v3, 4  ;;  %v926_v34 = vsel %vm918_vm4, 1.0, %v2867_v49  ;;  %v2955_v55 = vld [vmem:[#allocation36_spill] sm:$0xff] }
 0x18e   : > { %v1058_v24 = vsel %vm1057_vm1, %v2948_v28, %v1056_v61  ;;  %v2954_v47 = vrot.slane %v2953_v38, 4  ;;  %v1344_v2 = vand.u32 2147483647, %v1336_v44  ;;  %v1125_v15 = vadd.f32 %v1124_v39, %v2955_v55  ;;  %v2961_v38 = vld [vmem:[#allocation38_spill] sm:$0xff]  ;;  %v1254_v55 = vpop.permute.xlu2 %1253 }
 0x18f   : > { %v757_v26 = vadd.f32 %v756_v7, %v2947_v33  ;;  %v1065_v50 = vsel %vm1057_vm1, %v1056_v61, %v2950_v6  ;;  %v1074_v59 = vsel %vm1057_vm1, %v2952_v58, %v1073_v41  ;;  %v1088_v8 = vsub.f32 %v1058_v24, %v1750_v31  ;;  %v975_v61 = vpop.permute.xlu0 %974  ;;  %v2959_v33 = vld [vmem:[#allocation35_spill] sm:$0xff] }
 0x190   : > { %v1081_v57 = vsel %vm1057_vm1, %v1073_v41, %v2954_v47  ;;  %v1089_v36 = vsub.f32 %v1065_v50, %v1776_v42  ;;  %v1104_v27 = vmul.f32 %v1074_v59, %v907_v23  ;;  %v1020_v16 = vmul.f32 %v1012_v51, %v2956_v1 }
 0x191   : > { %758 = vadd.xlane.f32.xlu2 %v757_v26  ;;  %v1105_v29 = vmul.f32 %v1081_v57, %v908_v9  ;;  %v2717_v54 = vmul.f32 %v2516_v46, %v1169_v17  ;;  %v1096_v11 = vand.u32 2147483647, %v1088_v8  ;;  %v1367_v12 = vmul.f32 %v1359_v19, %v1168_v4  ;;  %v2958_v9 = vld [vmem:[#allocation25_spill] sm:$0xff]  ;;  %v2960_v19 = vld [vmem:[#allocation12_spill] sm:$0xff] }
 0x192   : > { %v1097_v13 = vand.u32 2147483647, %v1089_v36  ;;  %v935_v7 = vmul.f32 %v926_v34, %v2957_v45  ;;  %v1154_v32 = vand.u32 7, %v2909_v5  ;;  %v1373_v25 = vadd.f32 %v1372_v56, %v1366_v20  ;;  %s2757_s8 = spop %1545 }
 0x193   : > { %v1223_v44 = vmul.f32 %v2717_v54, %v2930_v48  ;;  %v1112_v23 = vmul.f32 %v1104_v27, %v1096_v11  ;;  %v1126_v39 = vadd.f32 %v1125_v15, %v2958_v9  ;;  %v1360_v51 = vmul.f32 %v1352_v37, %v1344_v2  ;;  %v2962_v11 = vld [vmem:[#allocation5_spill] sm:$0xff]  ;;  %s2759_s9 = spop %1547 }
 0x194   : > { %v973_v10 = vpop.permute.xlu1 %972  ;;  %v1113_v41 = vmul.f32 %v1105_v29, %v1097_v13  ;;  %vm1162_vm1 = vcmp.eq.s32.totalorder %v1154_v32, 0  ;;  %v1229_v46 = vadd.f32 %v1228_v52, %v1222_v60  ;;  %v1029_v26 = vmul.f32 %v2959_v33, %v2925_v53  ;;  %s1550_s10 = spop %1549 }
 0x195   : > { %v1028_v4 = vmul.f32 %v1020_v16, %v2925_v53  ;;  %v1120_v28 = vmul.f32 %v1112_v23, %v2960_v19  ;;  %v1170_v5 = vsel %vm1162_vm1, 1.0, %v2867_v49  ;;  %v1189_v37 = vmul.f32 %v2946_v30, %v2930_v48 }
 0x196   : > { %v1121_v56 = vmul.f32 %v1113_v41, %v935_v7  ;;  %v1181_v20 = vmul.f32 %v2946_v30, %v1170_v5  ;;  %v1230_v6 = vadd.f32 %v1229_v46, %v1223_v44  ;;  %v1368_v60 = vmul.f32 %v1360_v51, %v1169_v17  ;;  %v1256_v51 = vpop.permute.xlu2 %1255  ;;  %v2963_v46 = vld [vmem:[#allocation44_spill] sm:$0xff] }
 0x197   : > { %v1127_v24 = vadd.f32 %v1126_v39, %v1120_v28  ;;  %v1035_v50 = vadd.f32 %v2636_v18, %v1028_v4  ;;  %v1337_v3 = vsub.f32 %v2949_v63, %v1776_v42  ;;  %v1374_v58 = vadd.f32 %v1373_v25, %v1367_v12  ;;  %v1268_v30 = vpop.permute.xlu0 %1267 }
 0x198   : > { %v1224_v52 = vmul.f32 %v1181_v20, %v2930_v48  ;;  %v1353_v47 = vmul.f32 %v2961_v38, %v1189_v37  ;;  %v1216_v8 = vmul.f32 0.0, %v1170_v5  ;;  %v998_v48 = vsub.f32 %v973_v10, %v1750_v31 }
 0x199   : > { %v1128_v59 = vadd.f32 %v1127_v24, %v1121_v56  ;;  %v1036_v34 = vadd.f32 %v1035_v50, %v1029_v26  ;;  %v1345_v2 = vand.u32 2147483647, %v1337_v3  ;;  %v1375_v27 = vadd.f32 %v1374_v58, %v1368_v60 }
 0x19a   : > { %v1231_v36 = vadd.f32 %v1230_v6, %v1224_v52  ;;  %v1277_v63 = vsub.f32 %v2676_v22, %v1730_v21  ;;  %v1006_v1 = vand.u32 2147483647, %v998_v48  ;;  %v1278_v12 = vsub.f32 %v2674_v0, %v1762_v35 }
 0x19b   : > { %1129 = vadd.xlane.f32.xlu0 %v1128_v59  ;;  %v1361_v18 = vmul.f32 %v1353_v47, %v1345_v2  ;;  %v999_v32 = vsub.f32 %v975_v61, %v1776_v42  ;;  %v1279_v25 = vsub.f32 %v1254_v55, %v1750_v31  ;;  %v1294_v23 = vmul.f32 %v1268_v30, %v2668_v14 }
 0x19c   : > { %v1266_v57 = vpop.permute.xlu1 %1265  ;;  %1232 = vadd.xlane.f32.xlu1 %v1231_v36  ;;  %v1285_v45 = vand.u32 2147483647, %v1277_v63  ;;  %v1286_v44 = vand.u32 2147483647, %v1278_v12  ;;  %v1280_v31 = vsub.f32 %v1256_v51, %v1776_v42  ;;  %vm1395_vm9 = vcmask 24576  }
 0x19d   : > { %v1369_v17 = vmul.f32 %v1361_v18, %v1216_v8  ;;  %v1293_v16 = vmul.f32 %v1266_v57, %v2664_v40  ;;  %v1007_v9 = vand.u32 2147483647, %v999_v32  ;;  %v1287_v35 = vand.u32 2147483647, %v1279_v25 }
 0x19e   : > { %v1302_v33 = vmul.f32 %v1294_v23, %v1286_v44  ;;  %v1288_v5 = vand.u32 2147483647, %v1280_v31 }
 0x19f   : > { %v1376_v29 = vadd.f32 %v1375_v27, %v1369_v17  ;;  %v1301_v10 = vmul.f32 %v1293_v16, %v1285_v45  ;;  %v1270_v22 = vpop.permute.xlu0 %1269 }
 0x1a0   : > { %v1295_v0 = vmul.f32 %v1270_v22, %v2717_v54  ;;  %v1310_v28 = vmul.f32 %v1302_v33, %v2304_v62 }
 0x1a1   : > { %v1309_v41 = vmul.f32 %v1301_v10, %v2304_v62 }
 0x1a2   : > { %v1303_v19 = vmul.f32 %v1295_v0, %v1287_v35 }
 0x1a3   : > { %1377 = vadd.xlane.f32.xlu0 %v1376_v29  ;;  %v1316_v4 = vadd.f32 %v2650_v43, %v1309_v41 }
 0x1a4   : > { %v989_v15 = vpop.permute.xlu1 %988  ;;  %v1311_v6 = vmul.f32 %v1303_v19, %v2304_v62 }
 0x1a5   : > { %v1014_v13 = vmul.f32 %v989_v15, %v2962_v11  ;;  %v1317_v54 = vadd.f32 %v1316_v4, %v1310_v28 }
 0x1a7   : > { %v1022_v7 = vmul.f32 %v1014_v13, %v1006_v1  ;;  %v1318_v52 = vadd.f32 %v1317_v54, %v1311_v6  ;;  %v2964_v6 = vld [vmem:[#allocation6_spill] sm:$0xff]  ;;  %v863_v54 = vstv %s1550_s10 }
 0x1a8   : > { %vm859_vm5 = vcmp.eq.s32.totalorder %v2964_v6, 1  ;;  %vm578_vm6 = vcmp.eq.s32.totalorder %v2964_v6, 0  ;;  %vm1140_vm7 = vcmp.eq.s32.totalorder %v2964_v6, 2  ;;  %vm1388_vm8 = vcmp.eq.s32.totalorder %v2964_v6, 3 }
 0x1a9   : > { %v1030_v21 = vmul.f32 %v1022_v7, %v2925_v53 }
 0x1ab   : > { %v1037_v40 = vadd.f32 %v1036_v34, %v1030_v21 }
 0x1ac   : > { %v991_v39 = vpop.permute.xlu1 %990 }
 0x1ad   : > { %v1015_v61 = vmul.f32 %v991_v39, %v2963_v46 }
 0x1af   : > { %v1023_v26 = vmul.f32 %v1015_v61, %v1007_v9 }
 0x1b1   : > { %v1031_v14 = vmul.f32 %v1023_v26, %v2925_v53 }
 0x1b3   : > { %v1038_v56 = vadd.f32 %v1037_v40, %v1031_v14 }
 0x1b4   : > { %v1272_v24 = vpop.permute.xlu1 %1271 }
 0x1b5   : > { %v1296_v50 = vmul.f32 %v1272_v24, %v1181_v20  ;;  %1039 = vadd.xlane.f32.xlu2 %v1038_v56 }
 0x1b7   : > { %v1304_v37 = vmul.f32 %v1296_v50, %v1288_v5  ;;  %v860_v50 = vsel %vm859_vm5, 1.0, %v2867_v49 }
 0x1b9   : > { %v1312_v60 = vmul.f32 %v1304_v37, %v2304_v62  ;;  %v579_v37 = vsel %vm578_vm6, 1.0, %v2867_v49 }
 0x1bb   : > { %v1319_v42 = vadd.f32 %v1318_v52, %v1312_v60  ;;  %v582_v60 = vstv %s1544_s7  ;;  %v1141_v52 = vsel %vm1140_vm7, 1.0, %v2867_v49 }
 0x1bd   : > { %1320 = vadd.xlane.f32.xlu2 %v1319_v42 }
 0x1e3   : > { %v952_v43 = vpop.xlane.xlu1 %951 }
 0x1e4   : > { %v953_v3 = vrot.slane %v952_v43, 4 }
 0x1e6   : > { %v954_v58 = vadd.f32 %v953_v3, %v952_v43  ;;  %v864_v43 = vmul.f32 %v863_v54, %v860_v50  ;;  %v583_v3 = vmul.f32 %v582_v60, %v579_v37 }
 0x1e8   : > { %v955_v38 = vrot.slane %v954_v58, 2 }
 0x1ea   : > { %v956_v2 = vadd.f32 %v955_v38, %v954_v58  ;;  %v1389_v38 = vsel %vm1388_vm8, 1.0, %v2867_v49 }
 0x1ec   : > { %v957_v62 = vrot.slane %v956_v2, 1 }
 0x1ee   : > { %v958_v63 = vadd.f32 %v957_v62, %v956_v2 }
 0x1fc   : > { %v849_v53 = vpop.xlane.xlu0 %848 }
 0x1fd   : > { %v850_v59 = vrot.slane %v849_v53, 4 }
 0x1ff   : > { %v851_v34 = vadd.f32 %v850_v59, %v849_v53 }
 0x201   : > { %v852_v47 = vrot.slane %v851_v34, 2 }
 0x203   : > { %v853_v36 = vadd.f32 %v852_v47, %v851_v34  ;;  %v486_v34 = vstv %s2757_s8  ;;  %v576_v47 = vstv %s2759_s9 }
 0x204   : > { %v759_v57 = vpop.xlane.xlu2 %758 }
 0x205   : > { %v760_v8 = vrot.slane %v759_v57, 4  ;;  %v854_v27 = vrot.slane %v853_v36, 1 }
 0x207   : > { %v761_v20 = vadd.f32 %v760_v8, %v759_v57  ;;  %v855_v48 = vadd.f32 %v854_v27, %v853_v36  ;;  %v865_v57 = vadd.f32 %v864_v43, %v583_v3 }
 0x209   : > { %v762_v18 = vrot.slane %v761_v20, 2 }
 0x20b   : > { %v763_v30 = vadd.f32 %v762_v18, %v761_v20 }
 0x20d   : > { %v764_v17 = vrot.slane %v763_v30, 1 }
 0x20e   : > { %v1130_v55 = vpop.xlane.xlu0 %1129 }
 0x20f   : > { %v765_v29 = vadd.f32 %v764_v17, %v763_v30  ;;  %v1233_v15 = vpop.xlane.xlu1 %1232  ;;  %v1131_v16 = vrot.slane %v1130_v55, 4  ;;  %v577_v30 = vadd.f32 %v576_v47, %v486_v34 }
 0x210   : > { %v1234_v1 = vrot.slane %v1233_v15, 4 }
 0x211   : > { %1551 = vpush %v765_v29  ;;  %v1132_v13 = vadd.f32 %v1131_v16, %v1130_v55  ;;  %v580_v49 = vmul.f32 %v579_v37, %v577_v30 }
 0x212   : > { %1553 = vpush %v855_v48  ;;  %v1235_v11 = vadd.f32 %v1234_v1, %v1233_v15 }
 0x213   : > { %1555 = vpush %v958_v63  ;;  %v1133_v7 = vrot.slane %v1132_v13, 2 }
 0x214   : > { %v1236_v45 = vrot.slane %v1235_v11, 2 }
 0x215   : > { %v1134_v23 = vadd.f32 %v1133_v7, %v1132_v13 }
 0x216   : > { %v1378_v12 = vpop.xlane.xlu0 %1377  ;;  %v1237_v21 = vadd.f32 %v1236_v45, %v1235_v11 }
 0x217   : > { %v1379_v10 = vrot.slane %v1378_v12, 4  ;;  %v1135_v35 = vrot.slane %v1134_v23, 1 }
 0x218   : > { %v1238_v39 = vrot.slane %v1237_v21, 1 }
 0x219   : > { %v1380_v44 = vadd.f32 %v1379_v10, %v1378_v12  ;;  %v1136_v4 = vadd.f32 %v1135_v35, %v1134_v23 }
 0x21a   : > { %v1239_v26 = vadd.f32 %v1238_v39, %v1237_v21 }
 0x21b   : > { %v1381_v51 = vrot.slane %v1380_v44, 2 }
 0x21d   : > { %v1382_v31 = vadd.f32 %v1381_v51, %v1380_v44 }
 0x21f   : > { %v1383_v28 = vrot.slane %v1382_v31, 1 }
 0x221   : > { %v1384_v24 = vadd.f32 %v1383_v28, %v1382_v31 }
 0x228   : > { %v1040_v32 = vpop.xlane.xlu2 %1039 }
 0x229   : > { %v1041_v25 = vrot.slane %v1040_v32, 4 }
 0x22b   : > { %v1042_v22 = vadd.f32 %v1041_v25, %v1040_v32 }
 0x22d   : > { %v1043_v40 = vrot.slane %v1042_v22, 2 }
 0x22f   : > { %v1044_v9 = vadd.f32 %v1043_v40, %v1042_v22 }
 0x230   : > { %v1321_v41 = vpop.xlane.xlu2 %1320 }
 0x231   : > { %v1322_v0 = vrot.slane %v1321_v41, 4  ;;  %v1045_v46 = vrot.slane %v1044_v9, 1 }
 0x233   : > { %v1323_v61 = vadd.f32 %v1322_v0, %v1321_v41  ;;  %v1046_v33 = vadd.f32 %v1045_v46, %v1044_v9 }
 0x235   : > { %v1324_v19 = vrot.slane %v1323_v61, 2  ;;  %1557 = vpush %v1046_v33 }
 0x236   : > { %1559 = vpush %v1136_v4 }
 0x237   : > { %v1325_v14 = vadd.f32 %v1324_v19, %v1323_v61  ;;  %1561 = vpush %v1239_v26 }
 0x239   : > { %v1326_v5 = vrot.slane %v1325_v14, 1 }
 0x23b   : > { %v1327_v56 = vadd.f32 %v1326_v5, %v1325_v14 }
 0x23d   : > { %1563 = vpush %v1327_v56 }
 0x23e   : > { %1565 = vpush %v1384_v24 }
 0x242   : > { %s1552_s11 = spop %1551 }
 0x243   : > { %s1554_s12 = spop %1553  ;;  %v767_v58 = vstv %s1552_s11 }
 0x244   : > { %s1556_s13 = spop %1555  ;;  %v857_v53 = vstv %s1554_s12 }
 0x245   : > { %v1144_v42 = vstv %s1556_s13  ;;  %v858_v20 = vadd.f32 %v857_v53, %v767_v58 }
 0x246   : > { %v1145_v59 = vmul.f32 %v1144_v42, %v1141_v52 }
 0x247   : > { %v861_v48 = vmul.f32 %v860_v50, %v858_v20 }
 0x248   : > { %v1146_v18 = vadd.f32 %v1145_v59, %v865_v57 }
 0x249   : > { %v862_v15 = vadd.f32 %v861_v48, %v580_v49 }
 0x266   : > { %s1558_s14 = spop %1557 }
 0x267   : > { %s1560_s19 = spop %1559  ;;  %v1048_v8 = vstv %s1558_s14 }
 0x268   : > { %v1138_v36 = vstv %s1560_s19  ;;  %s1562_s20 = spop %1561 }
 0x269   : > { %v1392_v2 = vstv %s1562_s20  ;;  %v1139_v62 = vadd.f32 %v1138_v36, %v1048_v8 }
 0x26a   : > { %v1393_v27 = vmul.f32 %v1392_v2, %v1389_v38 }
 0x26b   : > { %v1142_v29 = vmul.f32 %v1141_v52, %v1139_v62 }
 0x26c   : > { %v1394_v17 = vadd.f32 %v1393_v27, %v1146_v18 }
 0x26d   : > { %v1143_v16 = vadd.f32 %v1142_v29, %v862_v15 }
 0x26e   : > { %1397 = vst.msk [vmem:[%s311_s23] sm:$0x1] %vm1395_vm9, %v1394_v17  ;;  %s1564_s24 = spop %1563 }
 0x26f   : > { %v1329_v63 = vstv %s1564_s24  ;;  %s1566_s25 = spop %1565 }
 0x270   : > { %v1386_v55 = vstv %s1566_s25 }
 0x271   : > { %v1387_v1 = vadd.f32 %v1386_v55, %v1329_v63 }
 0x273   : > { %v1390_v11 = vmul.f32 %v1389_v38, %v1387_v1 }
 0x275   : > { %v1391_v13 = vadd.f32 %v1390_v11, %v1143_v16 }
 0x277   : > { %1396 = vst.msk [vmem:[%s306_s28] sm:$0x1] %vm1395_vm9, %v1391_v13 }
 0x278 PF: > { %s15_s17 = sadd.s32 1, %s1626_s17   ;;  %s2965_s15 = smov %s1622_s16 }
 0x279   : > { %p12_p5 = scmp.ge.s32.totalorder %s15_s17, 4   ;;  %s2966_s16 = smov %s2968_s18 }
 0x27b   :  { %14 = sbr.rel (!%p12_p5) target bundleno = 2 (0x2), region = 80 }

</bundles_post_ra>
